<compile_context>
chip_gen: v6e
topology: v6e:2x2x1
jax: 0.10.0
libtpu: 0.0.40
codegen_flags: <defaults>
</compile_context>

<pallas_src>
import functools
import math

import jax
import jax.numpy as jnp
from jax import lax
from jax.experimental import pallas as pl
from jax.experimental.pallas import tpu as pltpu

OT_REG = 0.1
OT_TAU = 0.5
NUM_SINKHORN_ITERS = 1000      # POT numItermax
SINKHORN_STOP_THR = 1e-6       # POT stopThr
SINKHORN_CHUNK = 16            # iterations between convergence checks (unrolled)
_F32_BIG = 3.0e38              # "finite" threshold: abs(x) < _F32_BIG


# --------------------------------------------------------------------------- #
# Kernel
# --------------------------------------------------------------------------- #
def _ot_attn_kernel(x_ref, y_ref, out_ref, *, reg, reg_m, n_iters, stop_thr,
                    chunk):
    bb, n, _ = x_ref.shape
    m = y_ref.shape[1]

    x = x_ref[...].astype(jnp.float32)                     # (bb, N, D)
    y = y_ref[...].astype(jnp.float32)                     # (bb, M, D)

    # normalize_feature: subtract per-row min along the feature axis.
    x = x - jnp.min(x, axis=-1, keepdims=True)
    y = y - jnp.min(y, axis=-1, keepdims=True)

    # Squared-Euclidean pairwise cost, built directly in the TRANSPOSED
    # orientation: cost_t[b, m, n] = ||y[b,m] - x[b,n]||^2 == cdist(x,y)^2.T
    x2 = jnp.sum(x * x, axis=-1)[:, None, :]               # (bb, 1, N)
    y2 = jnp.sum(y * y, axis=-1)[:, :, None]               # (bb, M, 1)
    yx = jnp.einsum('bmd,bnd->bmn', y, x,
                    preferred_element_type=jnp.float32,
                    precision=lax.Precision.HIGHEST)       # (bb, M, N)
    cost_t = jnp.maximum(y2 + x2 - 2.0 * yx, 0.0)

    # Per-batch-element normalization; fold /cost_max and /reg into one scale.
    cost_max = jnp.max(jnp.max(cost_t, axis=2, keepdims=True), axis=1,
                       keepdims=True)                      # (bb, 1, 1)
    cost_max = jnp.where(cost_max > 0.0, cost_max, 1.0)    # guard 0/0 -> NaN
    kt = jnp.exp(cost_t * (-1.0 / (reg * cost_max)))       # Gibbs kernel^T

    fi = reg_m / (reg_m + reg)
    log_a_fi = fi * math.log(1.0 / n)                      # log(unif(N)^fi)
    log_b_fi = fi * math.log(1.0 / m)                      # log(unif(M)^fi)

    # Sublane-packed scalings: one chain per batch element, 2-D layout so the
    # exp/log EUP pushes cover up to 8 chains per vreg.
    u0 = jnp.full((bb, n), 1.0 / n, dtype=jnp.float32)
    v0 = jnp.full((bb, m), 1.0 / m, dtype=jnp.float32)

    def one_iter(_, carry):
        u, v = carry
        # Kv / K^T u as VPU broadcast-multiply + XLU reduction (no MXU matvec
        # push/pop latency on the serial Sinkhorn chain).
        kv = jnp.sum(kt * v[:, :, None], axis=1)           # (bb, N)
        u = jnp.exp(log_a_fi - fi * jnp.log(kv))           # (a / Kv)^fi
        ktu = jnp.sum(kt * u[:, None, :], axis=2)          # (bb, M)
        v = jnp.exp(log_b_fi - fi * jnp.log(ktu))          # (b / K^T u)^fi
        return u, v

    num_chunks = -(-n_iters // chunk)

    def cond(carry):
        it, err = carry[0], carry[1]
        return jnp.logical_and(it < num_chunks, err > stop_thr)

    def body(carry):
        it, _, max_u_prev, max_v_prev, u_prev, v_prev = carry
        u, v = lax.fori_loop(0, chunk, one_iter, (u_prev, v_prev), unroll=True)
        max_u = jnp.max(jnp.abs(u))
        max_v = jnp.max(jnp.abs(v))
        # Non-finite safeguard: NaN/inf fail the '< BIG' comparison.
        finite = jnp.logical_and(max_u < _F32_BIG, max_v < _F32_BIG)
        # POT-style relative-change stopping criterion (over the chunk); the
        # previous-chunk maxima are carried as scalars (no extra reductions).
        err_u = jnp.max(jnp.abs(u - u_prev)) / jnp.maximum(
            jnp.maximum(max_u, max_u_prev), 1.0)
        err_v = jnp.max(jnp.abs(v - v_prev)) / jnp.maximum(
            jnp.maximum(max_v, max_v_prev), 1.0)
        err = jnp.where(finite, 0.5 * (err_u + err_v), jnp.float32(0.0))
        u = jnp.where(finite, u, u_prev)
        v = jnp.where(finite, v, v_prev)
        max_u = jnp.where(finite, max_u, max_u_prev)
        max_v = jnp.where(finite, max_v, max_v_prev)
        return it + 1, err, max_u, max_v, u, v

    init = (jnp.int32(0), jnp.float32(jnp.inf),
            jnp.float32(1.0 / n), jnp.float32(1.0 / m), u0, v0)
    _, _, _, _, u, v = lax.while_loop(cond, body, init)

    # flow.T directly from the (already transposed) Gibbs kernel:
    #   out[b, m, n] = KT[b, m, n] * u[b, n] * v[b, m]
    out = kt * u[:, None, :] * v[:, :, None]               # (bb, M, N)
    out_ref[...] = out.astype(out_ref.dtype)


# --------------------------------------------------------------------------- #
# Generation-aware block selection
# --------------------------------------------------------------------------- #
def _cdiv(a, b):
    return -(-a // b)


def _round_up(x, mult):
    return _cdiv(x, mult) * mult


def _padded_elems(sub, lane):
    """Elements of a (sub, lane) f32 tile after (8, 128) layout padding."""
    return _round_up(max(int(sub), 1), 8) * _round_up(max(int(lane), 1), 128)


def _block_vmem_bytes(bb, n, m, d):
    """Conservative per-grid-step VMEM footprint (bytes), incl. transients."""
    in_x = bb * _padded_elems(n, d)          # (bb, N, D) input block
    in_y = bb * _padded_elems(m, d)          # (bb, M, D) input block
    out = bb * _padded_elems(m, n)           # (bb, M, N) output block
    big = bb * _padded_elems(m, n)           # KT / cost_t / per-iter product
    uv = _padded_elems(bb, n) + _padded_elems(bb, m)
    # 2x for double-buffered pipeline blocks; ~4 live (M,N)-sized temporaries
    # at the prologue/loop peak; a handful of u/v-sized values.
    return 4 * (2 * (in_x + in_y + out) + 4 * big + 6 * uv)


def _tpu_generation_info():
    """Return (VMEM bytes per TensorCore, TensorCores sharing the grid)."""
    vmem_bytes, num_tc = 64 * 2**20, 2       # conservative default
    try:
        kind = jax.devices()[0].device_kind.lower()
    except Exception:
        kind = ""
    if "v7" in kind:
        vmem_bytes, num_tc = 64 * 2**20, 2
    elif "v6" in kind or "v5e" in kind or "lite" in kind:
        vmem_bytes, num_tc = 128 * 2**20, 1
    elif "v4" in kind or "v5" in kind:
        vmem_bytes, num_tc = 64 * 2**20, 2   # megacore generations
    try:  # refine (only ever lowers) with the runtime-reported capacity
        reported = int(pltpu.get_tpu_info().vmem_capacity_bytes)
        vmem_bytes = min(vmem_bytes, reported)
    except Exception:
        pass
    return vmem_bytes, num_tc


def _pick_batch_block(batch, n, m, d, vmem_budget, num_tc, requested=None):
    if requested is not None:
        if batch % requested != 0:
            raise ValueError(f'batch_block={requested} must divide B={batch}')
        return requested
    divisors = [b for b in range(1, batch + 1) if batch % b == 0]

    def feasible(bb):
        # vreg cap for the sublane-packed u/v chains (plus prev copies/temps).
        vregs = _cdiv(bb, 8) * (_cdiv(n, 128) + _cdiv(m, 128))
        if vregs > 16:
            return False
        return _block_vmem_bytes(bb, n, m, d) <= vmem_budget

    ok = [b for b in divisors if feasible(b)] or [1]
    if num_tc > 1:
        # Keep the parallel grid a multiple of the TC count so no core idles.
        balanced = [b for b in ok if (batch // b) % num_tc == 0]
        if balanced:
            return max(balanced)
    # Single TC: maximize chains per step / minimize grid steps.
    return max(ok)


# --------------------------------------------------------------------------- #
# Wrapper
# --------------------------------------------------------------------------- #
def ot_attn(x, y, *, reg=OT_REG, reg_m=OT_TAU, n_iters=NUM_SINKHORN_ITERS,
            stop_thr=SINKHORN_STOP_THR, batch_block=None):
    """x: (B, N, D), y: (B, M, D) -> (B, M, N) transport plan (transposed)."""
    B, N, D = x.shape
    B2, M, D2 = y.shape
    assert B == B2 and D == D2

    vmem_bytes, num_tc = _tpu_generation_info()
    vmem_limit = max(32 * 2**20, int(0.80 * vmem_bytes))
    bb = _pick_batch_block(B, N, M, D, int(0.85 * vmem_limit), num_tc,
                           batch_block)

    kernel = functools.partial(_ot_attn_kernel, reg=reg, reg_m=reg_m,
                               n_iters=n_iters, stop_thr=stop_thr,
                               chunk=SINKHORN_CHUNK)

    return pl.pallas_call(
        kernel,
        out_shape=jax.ShapeDtypeStruct((B, M, N), jnp.float32),
        grid_spec=pltpu.PrefetchScalarGridSpec(
            num_scalar_prefetch=0,
            grid=(B // bb,),
            in_specs=[
                pl.BlockSpec((bb, N, D), lambda i: (i, 0, 0)),
                pl.BlockSpec((bb, M, D), lambda i: (i, 0, 0)),
            ],
            out_specs=pl.BlockSpec((bb, M, N), lambda i: (i, 0, 0)),
        ),
        compiler_params=pltpu.CompilerParams(
            dimension_semantics=("parallel",),
            vmem_limit_bytes=vmem_limit),
    )(x, y)


# --------------------------------------------------------------------------- #
# Pure-JAX reference (POT-style column-vector formulation)
# --------------------------------------------------------------------------- #
def _ot_attn_reference(x, y, *, reg=OT_REG, reg_m=OT_TAU,
                       n_iters=NUM_SINKHORN_ITERS,
                       stop_thr=SINKHORN_STOP_THR):
    x = x.astype(jnp.float32)
    y = y.astype(jnp.float32)
    x = x - jnp.min(x, axis=-1, keepdims=True)
    y = y - jnp.min(y, axis=-1, keepdims=True)
    x2 = jnp.sum(x * x, axis=-1, keepdims=True)
    y2 = jnp.sum(y * y, axis=-1)[:, None, :]
    xy = jnp.einsum('bnd,bmd->bnm', x, y, precision=lax.Precision.HIGHEST)
    cost = jnp.maximum(x2 + y2 - 2.0 * xy, 0.0)
    cmax = jnp.max(cost, axis=(1, 2), keepdims=True)
    cmax = jnp.where(cmax > 0.0, cmax, 1.0)
    K = jnp.exp(-cost / (reg * cmax))
    B, N, M = K.shape
    fi = reg_m / (reg_m + reg)
    a, b = 1.0 / N, 1.0 / M
    u0 = jnp.full((B, N, 1), 1.0 / N, jnp.float32)
    v0 = jnp.full((B, M, 1), 1.0 / M, jnp.float32)
    num_chunks = -(-n_iters // SINKHORN_CHUNK)

    def one_iter(_, carry):
        u, v = carry
        kv = jnp.einsum('bnm,bmo->bno', K, v, precision=lax.Precision.HIGHEST)
        u = (a / kv) ** fi
        ktu = jnp.einsum('bnm,bno->bmo', K, u, precision=lax.Precision.HIGHEST)
        v = (b / ktu) ** fi
        return u, v

    def cond(carry):
        it, err, _, _ = carry
        return jnp.logical_and(it < num_chunks, err > stop_thr)

    def body(carry):
        it, _, u_prev, v_prev = carry
        u, v = lax.fori_loop(0, SINKHORN_CHUNK, one_iter, (u_prev, v_prev))
        finite = jnp.logical_and(jnp.max(jnp.abs(u)) < _F32_BIG,
                                 jnp.max(jnp.abs(v)) < _F32_BIG)
        err_u = jnp.max(jnp.abs(u - u_prev)) / jnp.maximum(
            jnp.maximum(jnp.max(jnp.abs(u)), jnp.max(jnp.abs(u_prev))), 1.0)
        err_v = jnp.max(jnp.abs(v - v_prev)) / jnp.maximum(
            jnp.maximum(jnp.max(jnp.abs(v)), jnp.max(jnp.abs(v_prev))), 1.0)
        err = jnp.where(finite, 0.5 * (err_u + err_v), jnp.float32(0.0))
        u = jnp.where(finite, u, u_prev)
        v = jnp.where(finite, v, v_prev)
        return it + 1, err, u, v

    init = (jnp.int32(0), jnp.float32(jnp.inf), u0, v0)
    _, _, u, v = lax.while_loop(cond, body, init)
    flow = u * K * jnp.swapaxes(v, 1, 2)                   # (B, N, M)
    return jnp.swapaxes(flow, 1, 2)                        # (B, M, N)


# --------------------------------------------------------------------------- #
# Self-test
# --------------------------------------------------------------------------- #
def _run_case(B, N, M, D, key):
    kx, ky = jax.random.split(key)
    x = jax.random.normal(kx, (B, N, D), dtype=jnp.float32)
    y = jax.random.normal(ky, (B, M, D), dtype=jnp.float32)

    pi = ot_attn(x, y)
    jax.block_until_ready(pi)
    assert pi.shape == (B, M, N), pi.shape
    assert bool(jnp.all(jnp.isfinite(pi)))

    pi_ref = _ot_attn_reference(x, y)
    jax.block_until_ready(pi_ref)
    max_abs = float(jnp.max(jnp.abs(pi - pi_ref)))
    assert jnp.allclose(pi, pi_ref, rtol=3e-2, atol=3e-4), max_abs


if __name__ == "__main__":
    key1, key2 = jax.random.split(jax.random.PRNGKey(0))
    # Small shapes consistent with the module: x (B, N, D), y (B, M, D).
    _run_case(B=2, N=8, M=16, D=32, key=key1)
    _run_case(B=4, N=16, M=8, D=32, key=key2)
    print("KERNEL_OK")
</pallas_src>

<mosaic_0001>
module attributes {stable_mosaic.version = 11 : i64} {
  func.func @_ot_attn_kernel(%arg0: i32, %arg1: memref<1x8x32xf32, #tpu.memory_space<vmem>>, %arg2: memref<1x16x32xf32, #tpu.memory_space<vmem>>, %arg3: memref<1x16x8xf32, #tpu.memory_space<vmem>>) attributes {dimension_semantics = [#tpu.dimension_semantics<parallel>], iteration_bounds = array<i64: 2>, scalar_prefetch = 0 : i64, scratch_operands = 0 : i64, tpu.core_type = #tpu.core_type<tc>, window_params = [{transform_indices = @transform_0, window_bounds = array<i64: 1, 8, 32>}, {transform_indices = @transform_1, window_bounds = array<i64: 1, 16, 32>}, {transform_indices = @transform_2, window_bounds = array<i64: 1, 16, 8>}]} {
    %c0 = arith.constant 0 : index
    %c0_0 = arith.constant 0 : index
    %c0_1 = arith.constant 0 : index
    %0 = vector.load %arg1[%c0, %c0_0, %c0_1] : memref<1x8x32xf32, #tpu.memory_space<vmem>>, vector<1x8x32xf32>
    %c0_2 = arith.constant 0 : index
    %c0_3 = arith.constant 0 : index
    %c0_4 = arith.constant 0 : index
    %1 = vector.load %arg2[%c0_2, %c0_3, %c0_4] : memref<1x16x32xf32, #tpu.memory_space<vmem>>, vector<1x16x32xf32>
    %cst = arith.constant dense<0x7F800000> : vector<1x8xf32>
    %2 = vector.multi_reduction <minimumf>, %0, %cst [2] : vector<1x8x32xf32> to vector<1x8xf32>
    %3 = vector.shape_cast %2 : vector<1x8xf32> to vector<1x8x1xf32>
    %4 = vector.broadcast %3 : vector<1x8x1xf32> to vector<1x8x32xf32>
    %5 = arith.subf %0, %4 : vector<1x8x32xf32>
    %cst_5 = arith.constant dense<0x7F800000> : vector<1x16xf32>
    %6 = vector.multi_reduction <minimumf>, %1, %cst_5 [2] : vector<1x16x32xf32> to vector<1x16xf32>
    %7 = vector.shape_cast %6 : vector<1x16xf32> to vector<1x16x1xf32>
    %8 = vector.broadcast %7 : vector<1x16x1xf32> to vector<1x16x32xf32>
    %9 = arith.subf %1, %8 : vector<1x16x32xf32>
    %10 = arith.mulf %5, %5 : vector<1x8x32xf32>
    %cst_6 = arith.constant dense<0.000000e+00> : vector<1x8xf32>
    %11 = vector.multi_reduction <add>, %10, %cst_6 [2] : vector<1x8x32xf32> to vector<1x8xf32>
    %12 = vector.shape_cast %11 : vector<1x8xf32> to vector<1x1x8xf32>
    %13 = arith.mulf %9, %9 : vector<1x16x32xf32>
    %cst_7 = arith.constant dense<0.000000e+00> : vector<1x16xf32>
    %14 = vector.multi_reduction <add>, %13, %cst_7 [2] : vector<1x16x32xf32> to vector<1x16xf32>
    %15 = vector.shape_cast %14 : vector<1x16xf32> to vector<1x16x1xf32>
    "tpu.trace_start"() <{level = 10 : i32, message = "bmd,bnd->bmn"}> : () -> ()
    %cst_8 = arith.constant dense<0.000000e+00> : vector<1x16x8xf32>
    %16 = tpu.matmul %9, %5, %cst_8 {dimension_numbers = #tpu.dot_dimension_numbers<[2], [2], [1], [1], [0, 0, 0, 1, 1, 1], [0], [0]>, precision = #tpu.contract_precision<fp32>} : vector<1x16x32xf32>, vector<1x8x32xf32>, vector<1x16x8xf32> -> vector<1x16x8xf32>
    "tpu.trace_stop"() : () -> ()
    %17 = vector.broadcast %15 : vector<1x16x1xf32> to vector<1x16x8xf32>
    %18 = vector.broadcast %12 : vector<1x1x8xf32> to vector<1x16x8xf32>
    %19 = arith.addf %17, %18 : vector<1x16x8xf32>
    %cst_9 = arith.constant 2.000000e+00 : f32
    %20 = vector.broadcast %cst_9 : f32 to vector<1x16x8xf32>
    %21 = arith.mulf %20, %16 : vector<1x16x8xf32>
    %22 = arith.subf %19, %21 : vector<1x16x8xf32>
    %cst_10 = arith.constant 0.000000e+00 : f32
    %23 = vector.broadcast %cst_10 : f32 to vector<1x16x8xf32>
    %24 = arith.maximumf %22, %23 : vector<1x16x8xf32>
    %cst_11 = arith.constant dense<0xFF800000> : vector<1x16xf32>
    %25 = vector.multi_reduction <maximumf>, %24, %cst_11 [2] : vector<1x16x8xf32> to vector<1x16xf32>
    %26 = vector.shape_cast %25 : vector<1x16xf32> to vector<1x16x1xf32>
    %cst_12 = arith.constant dense<0xFF800000> : vector<1x1xf32>
    %27 = vector.multi_reduction <maximumf>, %26, %cst_12 [1] : vector<1x16x1xf32> to vector<1x1xf32>
    %28 = vector.shape_cast %27 : vector<1x1xf32> to vector<1x1x1xf32>
    %cst_13 = arith.constant 0.000000e+00 : f32
    %29 = vector.broadcast %cst_13 : f32 to vector<1x1x1xf32>
    %30 = arith.cmpf ogt, %28, %29 : vector<1x1x1xf32>
    %cst_14 = arith.constant 1.000000e+00 : f32
    %31 = vector.broadcast %cst_14 : f32 to vector<1x1x1xf32>
    %32 = arith.select %30, %28, %31 : vector<1x1x1xi1>, vector<1x1x1xf32>
    %cst_15 = arith.constant 1.000000e-01 : f32
    %33 = vector.broadcast %cst_15 : f32 to vector<1x1x1xf32>
    %34 = arith.mulf %33, %32 : vector<1x1x1xf32>
    %cst_16 = arith.constant -1.000000e+00 : f32
    %35 = vector.broadcast %cst_16 : f32 to vector<1x1x1xf32>
    %36 = arith.divf %35, %34 : vector<1x1x1xf32>
    %37 = vector.broadcast %36 : vector<1x1x1xf32> to vector<1x16x8xf32>
    %38 = arith.mulf %24, %37 : vector<1x16x8xf32>
    %39 = math.exp %38 : vector<1x16x8xf32>
    %cst_17 = arith.constant 1.250000e-01 : f32
    %40 = vector.broadcast %cst_17 : f32 to vector<1x8xf32>
    %cst_18 = arith.constant 6.250000e-02 : f32
    %41 = vector.broadcast %cst_18 : f32 to vector<1x16xf32>
    %c0_i32 = arith.constant 0 : i32
    %cst_19 = arith.constant 0x7F800000 : f32
    %cst_20 = arith.constant 1.250000e-01 : f32
    %cst_21 = arith.constant 6.250000e-02 : f32
    %42:6 = scf.while (%arg4 = %c0_i32, %arg5 = %cst_19, %arg6 = %cst_20, %arg7 = %cst_21, %arg8 = %40, %arg9 = %41) : (i32, f32, f32, f32, vector<1x8xf32>, vector<1x16xf32>) -> (i32, f32, f32, f32, vector<1x8xf32>, vector<1x16xf32>) {
      %c63_i32 = arith.constant 63 : i32
      %50 = arith.cmpi slt, %arg4, %c63_i32 : i32
      %cst_25 = arith.constant 9.99999997E-7 : f32
      %51 = arith.cmpf ogt, %arg5, %cst_25 : f32
      %52 = arith.andi %50, %51 : i1
      scf.condition(%52) %arg4, %arg5, %arg6, %arg7, %arg8, %arg9 : i32, f32, f32, f32, vector<1x8xf32>, vector<1x16xf32>
    } do {
    ^bb0(%arg4: i32, %arg5: f32, %arg6: f32, %arg7: f32, %arg8: vector<1x8xf32>, %arg9: vector<1x16xf32>):
      %c0_i32_25 = arith.constant 0 : i32
      %50 = vector.shape_cast %arg9 : vector<1x16xf32> to vector<1x16x1xf32>
      %51 = vector.broadcast %50 : vector<1x16x1xf32> to vector<1x16x8xf32>
      %52 = arith.mulf %39, %51 : vector<1x16x8xf32>
      %cst_26 = arith.constant dense<0.000000e+00> : vector<1x8xf32>
      %53 = vector.multi_reduction <add>, %52, %cst_26 [1] : vector<1x16x8xf32> to vector<1x8xf32>
      %54 = math.log %53 : vector<1x8xf32>
      %cst_27 = arith.constant 0.833333313 : f32
      %55 = vector.broadcast %cst_27 : f32 to vector<1x8xf32>
      %56 = arith.mulf %55, %54 : vector<1x8xf32>
      %cst_28 = arith.constant -1.73286796 : f32
      %57 = vector.broadcast %cst_28 : f32 to vector<1x8xf32>
      %58 = arith.subf %57, %56 : vector<1x8xf32>
      %59 = math.exp %58 : vector<1x8xf32>
      %60 = vector.shape_cast %59 : vector<1x8xf32> to vector<1x1x8xf32>
      %61 = vector.broadcast %60 : vector<1x1x8xf32> to vector<1x16x8xf32>
      %62 = arith.mulf %39, %61 : vector<1x16x8xf32>
      %cst_29 = arith.constant dense<0.000000e+00> : vector<1x16xf32>
      %63 = vector.multi_reduction <add>, %62, %cst_29 [2] : vector<1x16x8xf32> to vector<1x16xf32>
      %64 = math.log %63 : vector<1x16xf32>
      %cst_30 = arith.constant 0.833333313 : f32
      %65 = vector.broadcast %cst_30 : f32 to vector<1x16xf32>
      %66 = arith.mulf %65, %64 : vector<1x16xf32>
      %cst_31 = arith.constant -2.31049061 : f32
      %67 = vector.broadcast %cst_31 : f32 to vector<1x16xf32>
      %68 = arith.subf %67, %66 : vector<1x16xf32>
      %69 = math.exp %68 : vector<1x16xf32>
      %c1_i32 = arith.constant 1 : i32
      %70 = vector.shape_cast %69 : vector<1x16xf32> to vector<1x16x1xf32>
      %71 = vector.broadcast %70 : vector<1x16x1xf32> to vector<1x16x8xf32>
      %72 = arith.mulf %39, %71 : vector<1x16x8xf32>
      %cst_32 = arith.constant dense<0.000000e+00> : vector<1x8xf32>
      %73 = vector.multi_reduction <add>, %72, %cst_32 [1] : vector<1x16x8xf32> to vector<1x8xf32>
      %74 = math.log %73 : vector<1x8xf32>
      %cst_33 = arith.constant 0.833333313 : f32
      %75 = vector.broadcast %cst_33 : f32 to vector<1x8xf32>
      %76 = arith.mulf %75, %74 : vector<1x8xf32>
      %cst_34 = arith.constant -1.73286796 : f32
      %77 = vector.broadcast %cst_34 : f32 to vector<1x8xf32>
      %78 = arith.subf %77, %76 : vector<1x8xf32>
      %79 = math.exp %78 : vector<1x8xf32>
      %80 = vector.shape_cast %79 : vector<1x8xf32> to vector<1x1x8xf32>
      %81 = vector.broadcast %80 : vector<1x1x8xf32> to vector<1x16x8xf32>
      %82 = arith.mulf %39, %81 : vector<1x16x8xf32>
      %cst_35 = arith.constant dense<0.000000e+00> : vector<1x16xf32>
      %83 = vector.multi_reduction <add>, %82, %cst_35 [2] : vector<1x16x8xf32> to vector<1x16xf32>
      %84 = math.log %83 : vector<1x16xf32>
      %cst_36 = arith.constant 0.833333313 : f32
      %85 = vector.broadcast %cst_36 : f32 to vector<1x16xf32>
      %86 = arith.mulf %85, %84 : vector<1x16xf32>
      %cst_37 = arith.constant -2.31049061 : f32
      %87 = vector.broadcast %cst_37 : f32 to vector<1x16xf32>
      %88 = arith.subf %87, %86 : vector<1x16xf32>
      %89 = math.exp %88 : vector<1x16xf32>
      %c2_i32 = arith.constant 2 : i32
      %90 = vector.shape_cast %89 : vector<1x16xf32> to vector<1x16x1xf32>
      %91 = vector.broadcast %90 : vector<1x16x1xf32> to vector<1x16x8xf32>
      %92 = arith.mulf %39, %91 : vector<1x16x8xf32>
      %cst_38 = arith.constant dense<0.000000e+00> : vector<1x8xf32>
      %93 = vector.multi_reduction <add>, %92, %cst_38 [1] : vector<1x16x8xf32> to vector<1x8xf32>
      %94 = math.log %93 : vector<1x8xf32>
      %cst_39 = arith.constant 0.833333313 : f32
      %95 = vector.broadcast %cst_39 : f32 to vector<1x8xf32>
      %96 = arith.mulf %95, %94 : vector<1x8xf32>
      %cst_40 = arith.constant -1.73286796 : f32
      %97 = vector.broadcast %cst_40 : f32 to vector<1x8xf32>
      %98 = arith.subf %97, %96 : vector<1x8xf32>
      %99 = math.exp %98 : vector<1x8xf32>
      %100 = vector.shape_cast %99 : vector<1x8xf32> to vector<1x1x8xf32>
      %101 = vector.broadcast %100 : vector<1x1x8xf32> to vector<1x16x8xf32>
      %102 = arith.mulf %39, %101 : vector<1x16x8xf32>
      %cst_41 = arith.constant dense<0.000000e+00> : vector<1x16xf32>
      %103 = vector.multi_reduction <add>, %102, %cst_41 [2] : vector<1x16x8xf32> to vector<1x16xf32>
      %104 = math.log %103 : vector<1x16xf32>
      %cst_42 = arith.constant 0.833333313 : f32
      %105 = vector.broadcast %cst_42 : f32 to vector<1x16xf32>
      %106 = arith.mulf %105, %104 : vector<1x16xf32>
      %cst_43 = arith.constant -2.31049061 : f32
      %107 = vector.broadcast %cst_43 : f32 to vector<1x16xf32>
      %108 = arith.subf %107, %106 : vector<1x16xf32>
      %109 = math.exp %108 : vector<1x16xf32>
      %c3_i32 = arith.constant 3 : i32
      %110 = vector.shape_cast %109 : vector<1x16xf32> to vector<1x16x1xf32>
      %111 = vector.broadcast %110 : vector<1x16x1xf32> to vector<1x16x8xf32>
      %112 = arith.mulf %39, %111 : vector<1x16x8xf32>
      %cst_44 = arith.constant dense<0.000000e+00> : vector<1x8xf32>
      %113 = vector.multi_reduction <add>, %112, %cst_44 [1] : vector<1x16x8xf32> to vector<1x8xf32>
      %114 = math.log %113 : vector<1x8xf32>
      %cst_45 = arith.constant 0.833333313 : f32
      %115 = vector.broadcast %cst_45 : f32 to vector<1x8xf32>
      %116 = arith.mulf %115, %114 : vector<1x8xf32>
      %cst_46 = arith.constant -1.73286796 : f32
      %117 = vector.broadcast %cst_46 : f32 to vector<1x8xf32>
      %118 = arith.subf %117, %116 : vector<1x8xf32>
      %119 = math.exp %118 : vector<1x8xf32>
      %120 = vector.shape_cast %119 : vector<1x8xf32> to vector<1x1x8xf32>
      %121 = vector.broadcast %120 : vector<1x1x8xf32> to vector<1x16x8xf32>
      %122 = arith.mulf %39, %121 : vector<1x16x8xf32>
      %cst_47 = arith.constant dense<0.000000e+00> : vector<1x16xf32>
      %123 = vector.multi_reduction <add>, %122, %cst_47 [2] : vector<1x16x8xf32> to vector<1x16xf32>
      %124 = math.log %123 : vector<1x16xf32>
      %cst_48 = arith.constant 0.833333313 : f32
      %125 = vector.broadcast %cst_48 : f32 to vector<1x16xf32>
      %126 = arith.mulf %125, %124 : vector<1x16xf32>
      %cst_49 = arith.constant -2.31049061 : f32
      %127 = vector.broadcast %cst_49 : f32 to vector<1x16xf32>
      %128 = arith.subf %127, %126 : vector<1x16xf32>
      %129 = math.exp %128 : vector<1x16xf32>
      %c4_i32 = arith.constant 4 : i32
      %130 = vector.shape_cast %129 : vector<1x16xf32> to vector<1x16x1xf32>
      %131 = vector.broadcast %130 : vector<1x16x1xf32> to vector<1x16x8xf32>
      %132 = arith.mulf %39, %131 : vector<1x16x8xf32>
      %cst_50 = arith.constant dense<0.000000e+00> : vector<1x8xf32>
      %133 = vector.multi_reduction <add>, %132, %cst_50 [1] : vector<1x16x8xf32> to vector<1x8xf32>
      %134 = math.log %133 : vector<1x8xf32>
      %cst_51 = arith.constant 0.833333313 : f32
      %135 = vector.broadcast %cst_51 : f32 to vector<1x8xf32>
      %136 = arith.mulf %135, %134 : vector<1x8xf32>
      %cst_52 = arith.constant -1.73286796 : f32
      %137 = vector.broadcast %cst_52 : f32 to vector<1x8xf32>
      %138 = arith.subf %137, %136 : vector<1x8xf32>
      %139 = math.exp %138 : vector<1x8xf32>
      %140 = vector.shape_cast %139 : vector<1x8xf32> to vector<1x1x8xf32>
      %141 = vector.broadcast %140 : vector<1x1x8xf32> to vector<1x16x8xf32>
      %142 = arith.mulf %39, %141 : vector<1x16x8xf32>
      %cst_53 = arith.constant dense<0.000000e+00> : vector<1x16xf32>
      %143 = vector.multi_reduction <add>, %142, %cst_53 [2] : vector<1x16x8xf32> to vector<1x16xf32>
      %144 = math.log %143 : vector<1x16xf32>
      %cst_54 = arith.constant 0.833333313 : f32
      %145 = vector.broadcast %cst_54 : f32 to vector<1x16xf32>
      %146 = arith.mulf %145, %144 : vector<1x16xf32>
      %cst_55 = arith.constant -2.31049061 : f32
      %147 = vector.broadcast %cst_55 : f32 to vector<1x16xf32>
      %148 = arith.subf %147, %146 : vector<1x16xf32>
      %149 = math.exp %148 : vector<1x16xf32>
      %c5_i32 = arith.constant 5 : i32
      %150 = vector.shape_cast %149 : vector<1x16xf32> to vector<1x16x1xf32>
      %151 = vector.broadcast %150 : vector<1x16x1xf32> to vector<1x16x8xf32>
      %152 = arith.mulf %39, %151 : vector<1x16x8xf32>
      %cst_56 = arith.constant dense<0.000000e+00> : vector<1x8xf32>
      %153 = vector.multi_reduction <add>, %152, %cst_56 [1] : vector<1x16x8xf32> to vector<1x8xf32>
      %154 = math.log %153 : vector<1x8xf32>
      %cst_57 = arith.constant 0.833333313 : f32
      %155 = vector.broadcast %cst_57 : f32 to vector<1x8xf32>
      %156 = arith.mulf %155, %154 : vector<1x8xf32>
      %cst_58 = arith.constant -1.73286796 : f32
      %157 = vector.broadcast %cst_58 : f32 to vector<1x8xf32>
      %158 = arith.subf %157, %156 : vector<1x8xf32>
      %159 = math.exp %158 : vector<1x8xf32>
      %160 = vector.shape_cast %159 : vector<1x8xf32> to vector<1x1x8xf32>
      %161 = vector.broadcast %160 : vector<1x1x8xf32> to vector<1x16x8xf32>
      %162 = arith.mulf %39, %161 : vector<1x16x8xf32>
      %cst_59 = arith.constant dense<0.000000e+00> : vector<1x16xf32>
      %163 = vector.multi_reduction <add>, %162, %cst_59 [2] : vector<1x16x8xf32> to vector<1x16xf32>
      %164 = math.log %163 : vector<1x16xf32>
      %cst_60 = arith.constant 0.833333313 : f32
      %165 = vector.broadcast %cst_60 : f32 to vector<1x16xf32>
      %166 = arith.mulf %165, %164 : vector<1x16xf32>
      %cst_61 = arith.constant -2.31049061 : f32
      %167 = vector.broadcast %cst_61 : f32 to vector<1x16xf32>
      %168 = arith.subf %167, %166 : vector<1x16xf32>
      %169 = math.exp %168 : vector<1x16xf32>
      %c6_i32 = arith.constant 6 : i32
      %170 = vector.shape_cast %169 : vector<1x16xf32> to vector<1x16x1xf32>
      %171 = vector.broadcast %170 : vector<1x16x1xf32> to vector<1x16x8xf32>
      %172 = arith.mulf %39, %171 : vector<1x16x8xf32>
      %cst_62 = arith.constant dense<0.000000e+00> : vector<1x8xf32>
      %173 = vector.multi_reduction <add>, %172, %cst_62 [1] : vector<1x16x8xf32> to vector<1x8xf32>
      %174 = math.log %173 : vector<1x8xf32>
      %cst_63 = arith.constant 0.833333313 : f32
      %175 = vector.broadcast %cst_63 : f32 to vector<1x8xf32>
      %176 = arith.mulf %175, %174 : vector<1x8xf32>
      %cst_64 = arith.constant -1.73286796 : f32
      %177 = vector.broadcast %cst_64 : f32 to vector<1x8xf32>
      %178 = arith.subf %177, %176 : vector<1x8xf32>
      %179 = math.exp %178 : vector<1x8xf32>
      %180 = vector.shape_cast %179 : vector<1x8xf32> to vector<1x1x8xf32>
      %181 = vector.broadcast %180 : vector<1x1x8xf32> to vector<1x16x8xf32>
      %182 = arith.mulf %39, %181 : vector<1x16x8xf32>
      %cst_65 = arith.constant dense<0.000000e+00> : vector<1x16xf32>
      %183 = vector.multi_reduction <add>, %182, %cst_65 [2] : vector<1x16x8xf32> to vector<1x16xf32>
      %184 = math.log %183 : vector<1x16xf32>
      %cst_66 = arith.constant 0.833333313 : f32
      %185 = vector.broadcast %cst_66 : f32 to vector<1x16xf32>
      %186 = arith.mulf %185, %184 : vector<1x16xf32>
      %cst_67 = arith.constant -2.31049061 : f32
      %187 = vector.broadcast %cst_67 : f32 to vector<1x16xf32>
      %188 = arith.subf %187, %186 : vector<1x16xf32>
      %189 = math.exp %188 : vector<1x16xf32>
      %c7_i32 = arith.constant 7 : i32
      %190 = vector.shape_cast %189 : vector<1x16xf32> to vector<1x16x1xf32>
      %191 = vector.broadcast %190 : vector<1x16x1xf32> to vector<1x16x8xf32>
      %192 = arith.mulf %39, %191 : vector<1x16x8xf32>
      %cst_68 = arith.constant dense<0.000000e+00> : vector<1x8xf32>
      %193 = vector.multi_reduction <add>, %192, %cst_68 [1] : vector<1x16x8xf32> to vector<1x8xf32>
      %194 = math.log %193 : vector<1x8xf32>
      %cst_69 = arith.constant 0.833333313 : f32
      %195 = vector.broadcast %cst_69 : f32 to vector<1x8xf32>
      %196 = arith.mulf %195, %194 : vector<1x8xf32>
      %cst_70 = arith.constant -1.73286796 : f32
      %197 = vector.broadcast %cst_70 : f32 to vector<1x8xf32>
      %198 = arith.subf %197, %196 : vector<1x8xf32>
      %199 = math.exp %198 : vector<1x8xf32>
      %200 = vector.shape_cast %199 : vector<1x8xf32> to vector<1x1x8xf32>
      %201 = vector.broadcast %200 : vector<1x1x8xf32> to vector<1x16x8xf32>
      %202 = arith.mulf %39, %201 : vector<1x16x8xf32>
      %cst_71 = arith.constant dense<0.000000e+00> : vector<1x16xf32>
      %203 = vector.multi_reduction <add>, %202, %cst_71 [2] : vector<1x16x8xf32> to vector<1x16xf32>
      %204 = math.log %203 : vector<1x16xf32>
      %cst_72 = arith.constant 0.833333313 : f32
      %205 = vector.broadcast %cst_72 : f32 to vector<1x16xf32>
      %206 = arith.mulf %205, %204 : vector<1x16xf32>
      %cst_73 = arith.constant -2.31049061 : f32
      %207 = vector.broadcast %cst_73 : f32 to vector<1x16xf32>
      %208 = arith.subf %207, %206 : vector<1x16xf32>
      %209 = math.exp %208 : vector<1x16xf32>
      %c8_i32 = arith.constant 8 : i32
      %210 = vector.shape_cast %209 : vector<1x16xf32> to vector<1x16x1xf32>
      %211 = vector.broadcast %210 : vector<1x16x1xf32> to vector<1x16x8xf32>
      %212 = arith.mulf %39, %211 : vector<1x16x8xf32>
      %cst_74 = arith.constant dense<0.000000e+00> : vector<1x8xf32>
      %213 = vector.multi_reduction <add>, %212, %cst_74 [1] : vector<1x16x8xf32> to vector<1x8xf32>
      %214 = math.log %213 : vector<1x8xf32>
      %cst_75 = arith.constant 0.833333313 : f32
      %215 = vector.broadcast %cst_75 : f32 to vector<1x8xf32>
      %216 = arith.mulf %215, %214 : vector<1x8xf32>
      %cst_76 = arith.constant -1.73286796 : f32
      %217 = vector.broadcast %cst_76 : f32 to vector<1x8xf32>
      %218 = arith.subf %217, %216 : vector<1x8xf32>
      %219 = math.exp %218 : vector<1x8xf32>
      %220 = vector.shape_cast %219 : vector<1x8xf32> to vector<1x1x8xf32>
      %221 = vector.broadcast %220 : vector<1x1x8xf32> to vector<1x16x8xf32>
      %222 = arith.mulf %39, %221 : vector<1x16x8xf32>
      %cst_77 = arith.constant dense<0.000000e+00> : vector<1x16xf32>
      %223 = vector.multi_reduction <add>, %222, %cst_77 [2] : vector<1x16x8xf32> to vector<1x16xf32>
      %224 = math.log %223 : vector<1x16xf32>
      %cst_78 = arith.constant 0.833333313 : f32
      %225 = vector.broadcast %cst_78 : f32 to vector<1x16xf32>
      %226 = arith.mulf %225, %224 : vector<1x16xf32>
      %cst_79 = arith.constant -2.31049061 : f32
      %227 = vector.broadcast %cst_79 : f32 to vector<1x16xf32>
      %228 = arith.subf %227, %226 : vector<1x16xf32>
      %229 = math.exp %228 : vector<1x16xf32>
      %c9_i32 = arith.constant 9 : i32
      %230 = vector.shape_cast %229 : vector<1x16xf32> to vector<1x16x1xf32>
      %231 = vector.broadcast %230 : vector<1x16x1xf32> to vector<1x16x8xf32>
      %232 = arith.mulf %39, %231 : vector<1x16x8xf32>
      %cst_80 = arith.constant dense<0.000000e+00> : vector<1x8xf32>
      %233 = vector.multi_reduction <add>, %232, %cst_80 [1] : vector<1x16x8xf32> to vector<1x8xf32>
      %234 = math.log %233 : vector<1x8xf32>
      %cst_81 = arith.constant 0.833333313 : f32
      %235 = vector.broadcast %cst_81 : f32 to vector<1x8xf32>
      %236 = arith.mulf %235, %234 : vector<1x8xf32>
      %cst_82 = arith.constant -1.73286796 : f32
      %237 = vector.broadcast %cst_82 : f32 to vector<1x8xf32>
      %238 = arith.subf %237, %236 : vector<1x8xf32>
      %239 = math.exp %238 : vector<1x8xf32>
      %240 = vector.shape_cast %239 : vector<1x8xf32> to vector<1x1x8xf32>
      %241 = vector.broadcast %240 : vector<1x1x8xf32> to vector<1x16x8xf32>
      %242 = arith.mulf %39, %241 : vector<1x16x8xf32>
      %cst_83 = arith.constant dense<0.000000e+00> : vector<1x16xf32>
      %243 = vector.multi_reduction <add>, %242, %cst_83 [2] : vector<1x16x8xf32> to vector<1x16xf32>
      %244 = math.log %243 : vector<1x16xf32>
      %cst_84 = arith.constant 0.833333313 : f32
      %245 = vector.broadcast %cst_84 : f32 to vector<1x16xf32>
      %246 = arith.mulf %245, %244 : vector<1x16xf32>
      %cst_85 = arith.constant -2.31049061 : f32
      %247 = vector.broadcast %cst_85 : f32 to vector<1x16xf32>
      %248 = arith.subf %247, %246 : vector<1x16xf32>
      %249 = math.exp %248 : vector<1x16xf32>
      %c10_i32 = arith.constant 10 : i32
      %250 = vector.shape_cast %249 : vector<1x16xf32> to vector<1x16x1xf32>
      %251 = vector.broadcast %250 : vector<1x16x1xf32> to vector<1x16x8xf32>
      %252 = arith.mulf %39, %251 : vector<1x16x8xf32>
      %cst_86 = arith.constant dense<0.000000e+00> : vector<1x8xf32>
      %253 = vector.multi_reduction <add>, %252, %cst_86 [1] : vector<1x16x8xf32> to vector<1x8xf32>
      %254 = math.log %253 : vector<1x8xf32>
      %cst_87 = arith.constant 0.833333313 : f32
      %255 = vector.broadcast %cst_87 : f32 to vector<1x8xf32>
      %256 = arith.mulf %255, %254 : vector<1x8xf32>
      %cst_88 = arith.constant -1.73286796 : f32
      %257 = vector.broadcast %cst_88 : f32 to vector<1x8xf32>
      %258 = arith.subf %257, %256 : vector<1x8xf32>
      %259 = math.exp %258 : vector<1x8xf32>
      %260 = vector.shape_cast %259 : vector<1x8xf32> to vector<1x1x8xf32>
      %261 = vector.broadcast %260 : vector<1x1x8xf32> to vector<1x16x8xf32>
      %262 = arith.mulf %39, %261 : vector<1x16x8xf32>
      %cst_89 = arith.constant dense<0.000000e+00> : vector<1x16xf32>
      %263 = vector.multi_reduction <add>, %262, %cst_89 [2] : vector<1x16x8xf32> to vector<1x16xf32>
      %264 = math.log %263 : vector<1x16xf32>
      %cst_90 = arith.constant 0.833333313 : f32
      %265 = vector.broadcast %cst_90 : f32 to vector<1x16xf32>
      %266 = arith.mulf %265, %264 : vector<1x16xf32>
      %cst_91 = arith.constant -2.31049061 : f32
      %267 = vector.broadcast %cst_91 : f32 to vector<1x16xf32>
      %268 = arith.subf %267, %266 : vector<1x16xf32>
      %269 = math.exp %268 : vector<1x16xf32>
      %c11_i32 = arith.constant 11 : i32
      %270 = vector.shape_cast %269 : vector<1x16xf32> to vector<1x16x1xf32>
      %271 = vector.broadcast %270 : vector<1x16x1xf32> to vector<1x16x8xf32>
      %272 = arith.mulf %39, %271 : vector<1x16x8xf32>
      %cst_92 = arith.constant dense<0.000000e+00> : vector<1x8xf32>
      %273 = vector.multi_reduction <add>, %272, %cst_92 [1] : vector<1x16x8xf32> to vector<1x8xf32>
      %274 = math.log %273 : vector<1x8xf32>
      %cst_93 = arith.constant 0.833333313 : f32
      %275 = vector.broadcast %cst_93 : f32 to vector<1x8xf32>
      %276 = arith.mulf %275, %274 : vector<1x8xf32>
      %cst_94 = arith.constant -1.73286796 : f32
      %277 = vector.broadcast %cst_94 : f32 to vector<1x8xf32>
      %278 = arith.subf %277, %276 : vector<1x8xf32>
      %279 = math.exp %278 : vector<1x8xf32>
      %280 = vector.shape_cast %279 : vector<1x8xf32> to vector<1x1x8xf32>
      %281 = vector.broadcast %280 : vector<1x1x8xf32> to vector<1x16x8xf32>
      %282 = arith.mulf %39, %281 : vector<1x16x8xf32>
      %cst_95 = arith.constant dense<0.000000e+00> : vector<1x16xf32>
      %283 = vector.multi_reduction <add>, %282, %cst_95 [2] : vector<1x16x8xf32> to vector<1x16xf32>
      %284 = math.log %283 : vector<1x16xf32>
      %cst_96 = arith.constant 0.833333313 : f32
      %285 = vector.broadcast %cst_96 : f32 to vector<1x16xf32>
      %286 = arith.mulf %285, %284 : vector<1x16xf32>
      %cst_97 = arith.constant -2.31049061 : f32
      %287 = vector.broadcast %cst_97 : f32 to vector<1x16xf32>
      %288 = arith.subf %287, %286 : vector<1x16xf32>
      %289 = math.exp %288 : vector<1x16xf32>
      %c12_i32 = arith.constant 12 : i32
      %290 = vector.shape_cast %289 : vector<1x16xf32> to vector<1x16x1xf32>
      %291 = vector.broadcast %290 : vector<1x16x1xf32> to vector<1x16x8xf32>
      %292 = arith.mulf %39, %291 : vector<1x16x8xf32>
      %cst_98 = arith.constant dense<0.000000e+00> : vector<1x8xf32>
      %293 = vector.multi_reduction <add>, %292, %cst_98 [1] : vector<1x16x8xf32> to vector<1x8xf32>
      %294 = math.log %293 : vector<1x8xf32>
      %cst_99 = arith.constant 0.833333313 : f32
      %295 = vector.broadcast %cst_99 : f32 to vector<1x8xf32>
      %296 = arith.mulf %295, %294 : vector<1x8xf32>
      %cst_100 = arith.constant -1.73286796 : f32
      %297 = vector.broadcast %cst_100 : f32 to vector<1x8xf32>
      %298 = arith.subf %297, %296 : vector<1x8xf32>
      %299 = math.exp %298 : vector<1x8xf32>
      %300 = vector.shape_cast %299 : vector<1x8xf32> to vector<1x1x8xf32>
      %301 = vector.broadcast %300 : vector<1x1x8xf32> to vector<1x16x8xf32>
      %302 = arith.mulf %39, %301 : vector<1x16x8xf32>
      %cst_101 = arith.constant dense<0.000000e+00> : vector<1x16xf32>
      %303 = vector.multi_reduction <add>, %302, %cst_101 [2] : vector<1x16x8xf32> to vector<1x16xf32>
      %304 = math.log %303 : vector<1x16xf32>
      %cst_102 = arith.constant 0.833333313 : f32
      %305 = vector.broadcast %cst_102 : f32 to vector<1x16xf32>
      %306 = arith.mulf %305, %304 : vector<1x16xf32>
      %cst_103 = arith.constant -2.31049061 : f32
      %307 = vector.broadcast %cst_103 : f32 to vector<1x16xf32>
      %308 = arith.subf %307, %306 : vector<1x16xf32>
      %309 = math.exp %308 : vector<1x16xf32>
      %c13_i32 = arith.constant 13 : i32
      %310 = vector.shape_cast %309 : vector<1x16xf32> to vector<1x16x1xf32>
      %311 = vector.broadcast %310 : vector<1x16x1xf32> to vector<1x16x8xf32>
      %312 = arith.mulf %39, %311 : vector<1x16x8xf32>
      %cst_104 = arith.constant dense<0.000000e+00> : vector<1x8xf32>
      %313 = vector.multi_reduction <add>, %312, %cst_104 [1] : vector<1x16x8xf32> to vector<1x8xf32>
      %314 = math.log %313 : vector<1x8xf32>
      %cst_105 = arith.constant 0.833333313 : f32
      %315 = vector.broadcast %cst_105 : f32 to vector<1x8xf32>
      %316 = arith.mulf %315, %314 : vector<1x8xf32>
      %cst_106 = arith.constant -1.73286796 : f32
      %317 = vector.broadcast %cst_106 : f32 to vector<1x8xf32>
      %318 = arith.subf %317, %316 : vector<1x8xf32>
      %319 = math.exp %318 : vector<1x8xf32>
      %320 = vector.shape_cast %319 : vector<1x8xf32> to vector<1x1x8xf32>
      %321 = vector.broadcast %320 : vector<1x1x8xf32> to vector<1x16x8xf32>
      %322 = arith.mulf %39, %321 : vector<1x16x8xf32>
      %cst_107 = arith.constant dense<0.000000e+00> : vector<1x16xf32>
      %323 = vector.multi_reduction <add>, %322, %cst_107 [2] : vector<1x16x8xf32> to vector<1x16xf32>
      %324 = math.log %323 : vector<1x16xf32>
      %cst_108 = arith.constant 0.833333313 : f32
      %325 = vector.broadcast %cst_108 : f32 to vector<1x16xf32>
      %326 = arith.mulf %325, %324 : vector<1x16xf32>
      %cst_109 = arith.constant -2.31049061 : f32
      %327 = vector.broadcast %cst_109 : f32 to vector<1x16xf32>
      %328 = arith.subf %327, %326 : vector<1x16xf32>
      %329 = math.exp %328 : vector<1x16xf32>
      %c14_i32 = arith.constant 14 : i32
      %330 = vector.shape_cast %329 : vector<1x16xf32> to vector<1x16x1xf32>
      %331 = vector.broadcast %330 : vector<1x16x1xf32> to vector<1x16x8xf32>
      %332 = arith.mulf %39, %331 : vector<1x16x8xf32>
      %cst_110 = arith.constant dense<0.000000e+00> : vector<1x8xf32>
      %333 = vector.multi_reduction <add>, %332, %cst_110 [1] : vector<1x16x8xf32> to vector<1x8xf32>
      %334 = math.log %333 : vector<1x8xf32>
      %cst_111 = arith.constant 0.833333313 : f32
      %335 = vector.broadcast %cst_111 : f32 to vector<1x8xf32>
      %336 = arith.mulf %335, %334 : vector<1x8xf32>
      %cst_112 = arith.constant -1.73286796 : f32
      %337 = vector.broadcast %cst_112 : f32 to vector<1x8xf32>
      %338 = arith.subf %337, %336 : vector<1x8xf32>
      %339 = math.exp %338 : vector<1x8xf32>
      %340 = vector.shape_cast %339 : vector<1x8xf32> to vector<1x1x8xf32>
      %341 = vector.broadcast %340 : vector<1x1x8xf32> to vector<1x16x8xf32>
      %342 = arith.mulf %39, %341 : vector<1x16x8xf32>
      %cst_113 = arith.constant dense<0.000000e+00> : vector<1x16xf32>
      %343 = vector.multi_reduction <add>, %342, %cst_113 [2] : vector<1x16x8xf32> to vector<1x16xf32>
      %344 = math.log %343 : vector<1x16xf32>
      %cst_114 = arith.constant 0.833333313 : f32
      %345 = vector.broadcast %cst_114 : f32 to vector<1x16xf32>
      %346 = arith.mulf %345, %344 : vector<1x16xf32>
      %cst_115 = arith.constant -2.31049061 : f32
      %347 = vector.broadcast %cst_115 : f32 to vector<1x16xf32>
      %348 = arith.subf %347, %346 : vector<1x16xf32>
      %349 = math.exp %348 : vector<1x16xf32>
      %c15_i32 = arith.constant 15 : i32
      %350 = vector.shape_cast %349 : vector<1x16xf32> to vector<1x16x1xf32>
      %351 = vector.broadcast %350 : vector<1x16x1xf32> to vector<1x16x8xf32>
      %352 = arith.mulf %39, %351 : vector<1x16x8xf32>
      %cst_116 = arith.constant dense<0.000000e+00> : vector<1x8xf32>
      %353 = vector.multi_reduction <add>, %352, %cst_116 [1] : vector<1x16x8xf32> to vector<1x8xf32>
      %354 = math.log %353 : vector<1x8xf32>
      %cst_117 = arith.constant 0.833333313 : f32
      %355 = vector.broadcast %cst_117 : f32 to vector<1x8xf32>
      %356 = arith.mulf %355, %354 : vector<1x8xf32>
      %cst_118 = arith.constant -1.73286796 : f32
      %357 = vector.broadcast %cst_118 : f32 to vector<1x8xf32>
      %358 = arith.subf %357, %356 : vector<1x8xf32>
      %359 = math.exp %358 : vector<1x8xf32>
      %360 = vector.shape_cast %359 : vector<1x8xf32> to vector<1x1x8xf32>
      %361 = vector.broadcast %360 : vector<1x1x8xf32> to vector<1x16x8xf32>
      %362 = arith.mulf %39, %361 : vector<1x16x8xf32>
      %cst_119 = arith.constant dense<0.000000e+00> : vector<1x16xf32>
      %363 = vector.multi_reduction <add>, %362, %cst_119 [2] : vector<1x16x8xf32> to vector<1x16xf32>
      %364 = math.log %363 : vector<1x16xf32>
      %cst_120 = arith.constant 0.833333313 : f32
      %365 = vector.broadcast %cst_120 : f32 to vector<1x16xf32>
      %366 = arith.mulf %365, %364 : vector<1x16xf32>
      %cst_121 = arith.constant -2.31049061 : f32
      %367 = vector.broadcast %cst_121 : f32 to vector<1x16xf32>
      %368 = arith.subf %367, %366 : vector<1x16xf32>
      %369 = math.exp %368 : vector<1x16xf32>
      %c16_i32 = arith.constant 16 : i32
      %370 = math.absf %359 : vector<1x8xf32>
      %371 = vector.shape_cast %370 : vector<1x8xf32> to vector<1x1x8xf32>
      %cst_122 = arith.constant dense<0xFF800000> : vector<1xf32>
      %372 = vector.multi_reduction <maximumf>, %371, %cst_122 [1, 2] : vector<1x1x8xf32> to vector<1xf32>
      %373 = vector.shape_cast %372 : vector<1xf32> to vector<1x1x1xf32>
      %374 = vector.extract %373[0, 0, 0] : f32 from vector<1x1x1xf32>
      %375 = math.absf %369 : vector<1x16xf32>
      %376 = vector.shape_cast %375 : vector<1x16xf32> to vector<1x1x16xf32>
      %cst_123 = arith.constant dense<0xFF800000> : vector<1xf32>
      %377 = vector.multi_reduction <maximumf>, %376, %cst_123 [1, 2] : vector<1x1x16xf32> to vector<1xf32>
      %378 = vector.shape_cast %377 : vector<1xf32> to vector<1x1x1xf32>
      %379 = vector.extract %378[0, 0, 0] : f32 from vector<1x1x1xf32>
      %cst_124 = arith.constant 3.000000e+38 : f32
      %380 = arith.cmpf olt, %374, %cst_124 : f32
      %cst_125 = arith.constant 3.000000e+38 : f32
      %381 = arith.cmpf olt, %379, %cst_125 : f32
      %382 = arith.andi %380, %381 : i1
      %383 = arith.subf %359, %arg8 : vector<1x8xf32>
      %384 = math.absf %383 : vector<1x8xf32>
      %385 = vector.shape_cast %384 : vector<1x8xf32> to vector<1x1x8xf32>
      %cst_126 = arith.constant dense<0xFF800000> : vector<1xf32>
      %386 = vector.multi_reduction <maximumf>, %385, %cst_126 [1, 2] : vector<1x1x8xf32> to vector<1xf32>
      %387 = vector.shape_cast %386 : vector<1xf32> to vector<1x1x1xf32>
      %388 = vector.extract %387[0, 0, 0] : f32 from vector<1x1x1xf32>
      %389 = arith.maximumf %374, %arg6 : f32
      %cst_127 = arith.constant 1.000000e+00 : f32
      %390 = arith.maximumf %389, %cst_127 : f32
      %391 = arith.divf %388, %390 : f32
      %392 = arith.subf %369, %arg9 : vector<1x16xf32>
      %393 = math.absf %392 : vector<1x16xf32>
      %394 = vector.shape_cast %393 : vector<1x16xf32> to vector<1x1x16xf32>
      %cst_128 = arith.constant dense<0xFF800000> : vector<1xf32>
      %395 = vector.multi_reduction <maximumf>, %394, %cst_128 [1, 2] : vector<1x1x16xf32> to vector<1xf32>
      %396 = vector.shape_cast %395 : vector<1xf32> to vector<1x1x1xf32>
      %397 = vector.extract %396[0, 0, 0] : f32 from vector<1x1x1xf32>
      %398 = arith.maximumf %379, %arg7 : f32
      %cst_129 = arith.constant 1.000000e+00 : f32
      %399 = arith.maximumf %398, %cst_129 : f32
      %400 = arith.divf %397, %399 : f32
      %401 = arith.addf %391, %400 : f32
      %cst_130 = arith.constant 5.000000e-01 : f32
      %402 = arith.mulf %cst_130, %401 : f32
      %cst_131 = arith.constant 0.000000e+00 : f32
      %403 = arith.select %382, %402, %cst_131 : f32
      %404 = arith.select %382, %359, %arg8 : vector<1x8xf32>
      %405 = arith.select %382, %369, %arg9 : vector<1x16xf32>
      %406 = arith.select %382, %374, %arg6 : f32
      %407 = arith.select %382, %379, %arg7 : f32
      %c1_i32_132 = arith.constant 1 : i32
      %408 = arith.addi %arg4, %c1_i32_132 : i32
      scf.yield %408, %403, %406, %407, %404, %405 : i32, f32, f32, f32, vector<1x8xf32>, vector<1x16xf32>
    }
    %43 = vector.shape_cast %42#4 : vector<1x8xf32> to vector<1x1x8xf32>
    %44 = vector.broadcast %43 : vector<1x1x8xf32> to vector<1x16x8xf32>
    %45 = arith.mulf %39, %44 : vector<1x16x8xf32>
    %46 = vector.shape_cast %42#5 : vector<1x16xf32> to vector<1x16x1xf32>
    %47 = vector.broadcast %46 : vector<1x16x1xf32> to vector<1x16x8xf32>
    %48 = arith.mulf %45, %47 : vector<1x16x8xf32>
    %c0_22 = arith.constant 0 : index
    %c0_23 = arith.constant 0 : index
    %c0_24 = arith.constant 0 : index
    %49 = vector.load %arg3[%c0_22, %c0_23, %c0_24] : memref<1x16x8xf32, #tpu.memory_space<vmem>>, vector<1x16x8xf32>
    tpu.vector_store %arg3[%c0_22, %c0_23, %c0_24], %48 {strides = array<i32>} : memref<1x16x8xf32, #tpu.memory_space<vmem>>, vector<1x16x8xf32>,
    return
  }
  func.func @transform_0(%arg0: i32) -> (i32, i32, i32) {
    %c0_i32 = arith.constant 0 : i32
    %c0_i32_0 = arith.constant 0 : i32
    %c0_i32_1 = arith.constant 0 : i32
    return %arg0, %c0_i32, %c0_i32_0 : i32, i32, i32
  }
  func.func @transform_1(%arg0: i32) -> (i32, i32, i32) {
    %c0_i32 = arith.constant 0 : i32
    %c0_i32_0 = arith.constant 0 : i32
    %c0_i32_1 = arith.constant 0 : i32
    return %arg0, %c0_i32, %c0_i32_0 : i32, i32, i32
  }
  func.func @transform_2(%arg0: i32) -> (i32, i32, i32) {
    %c0_i32 = arith.constant 0 : i32
    %c0_i32_0 = arith.constant 0 : i32
    %c0_i32_1 = arith.constant 0 : i32
    return %arg0, %c0_i32, %c0_i32_0 : i32, i32, i32
  }
}

</mosaic_0001>

<bundles_post_ra>
// kernel: tpu_custom_call.1
= control target key start
LH: loop header
LB: loop body
LE: loop exit
PB: predicated region body
PF: predicated region fallthrough
CT: control target
= control target key end

     0   :  { %7 = vsyncpa [#allocation3], 0  ;;  %s2503_s0 = inlined_call_operand.hbm [shape: f32[2,8,32], index: 0, kind: input, shape index: {}]   ;;  %s2504_s1 = inlined_call_operand.hbm [shape: f32[2,16,32], index: 1, kind: input, shape index: {}]   ;;  %s2505_s2 = inlined_call_operand.vmem [shape: f32[2,16,8], index: 2, kind: output, shape index: {}]  }
   0x1   :  { %9 = vsyncpa [#allocation3 + $0x1], 0 }
   0x2   :  { %10 = vsyncpa [#allocation5], 0 }
   0x3   :  { %12 = vsyncpa [#allocation5 + $0x1], 0  ;;  %s2108_s9 = smov 0   ;;  %s2110_s10 = smov 0  }
   0x4   :  { %s2112_s11 = smov 0   ;;  %s2114_s12 = smov 0  }
   0x5 LB: > { %s2127_s13 = sadd.s32 4294967295, %s2062_s12   ;;  %s2130_s14 = sadd.s32 1, %s2062_s12   ;;  %s2062_s12 = sphi %s2114_s12, %s2521_s12   ;;  %s2058_s11 = sphi %s2112_s11, %s2520_s11   ;;  %s2054_s10 = sphi %s2110_s10, %s2519_s10   ;;  %s2050_s9 = sphi %s2108_s9, %s2518_s9  }
   0x6   : > { %s22_s15 = ssub.s32 %s2062_s12, %s2130_s14  ;;  %s25_s16 = sadd.s32 1, %s2058_s11 }
   0x7   : > { %p23_p0 = scmp.eq.s32.totalorder %s22_s15, 0  ;;  %p32_p1 = scmp.ne.s32.totalorder %s2058_s11, %s2054_s10 }
   0x8   : > { %p33_p2 = scmp.eq.s32.totalorder %s2062_s12, 0  ;;  %p38_p3 = scmp.ne.s32.totalorder %s2054_s10, %s2050_s9 }
   0x9   : > { %s2140_s17 = scalar_select %p23_p0, %s2058_s11, %s25_s16  }
   0xa   : > { %p34_p4 = por %p33_p2, %p32_p1  ;;  %p39_p5 = scmp.eq.s32.totalorder %s2127_s13, 0 }
   0xb   : > { %p1658_p6 = scmp.lt.s32.totalorder %s2062_s12, 2  ;;  %s2149_s19 = sand.u32 1, %s2058_s11  }
   0xc   : > { %p2144_p7 = por %p39_p5, %p38_p3  ;;  %s1569_s20 = sshll.u32 %s2149_s19, 3 }
   0xd   : > { %s1570_s21 = sshll.u32 %s2062_s12, 7  ;;  %s118_s25 = scalar_lea.vmem [#allocation2], %s1569_s20 }
   0xe   : > { %s2507_s18 = scalar_select %p2144_p7, 1, 0 }
   0xf   : > { %s2156_s24 = scalar_lea.hbm %s2503_s0, %s1570_s21  ;;  %s125_s26 = sshll.u32 %s118_s25, 4  ;;  %s2158_s26 = int_to_ptr.vmem [resolvable:$true] %s125_s26 }
  0x10   : > { %p2160_p8 = pnand %p1658_p6, %p34_p4  ;;  %s115_s28 = scalar_lea.sflag [#allocation3], %s2149_s19 }
  0x11   : > { %s1944_s29 = scalar_lea.hbm %s2156_s24, 128  ;;  %s1949_s4 = scalar_lea.hbm %s2503_s0, 256 }
  0x12   : > { %p1945_p11 = scmp.ne.s32.totalorder %s2156_s24, %s1944_s29  ;;  %p1946_p12 = pneg %p2160_p8 }
  0x13   : > { %p1950_p1 = scmp.lt.s32.totalorder %s2156_s24, %s2503_s0  ;;  %p1951_p2 = scmp.lt.s32.totalorder %s1949_s4, %s1944_s29 }
  0x14   : > { %p1947_p13 = pnand %p1946_p12, %p1945_p11 }
  0x15   : > { %p1952_p3 = por %p1951_p2, %p1950_p1 }
  0x16   : > { %p1948_p0 = pneg %p1947_p13 }
  0x18   : > { %p1953_p4 = pnand %p1952_p3, %p1948_p0 }
  0x1a   : > { %1956 = shalt.err (!%p1953_p4)
}
  0x1b   : > { %s1957_s7 = scalar_lea.vmem %s2158_s26, 128  ;;  %s2088_s8 = smov [#allocation2]  }
  0x1c   : > { %p1958_p5 = scmp.ne.s32.totalorder %s2158_s26, %s1957_s7  ;;  %s1962_s9 = sshll.u32 %s2088_s8, 4  ;;  %s1963_s9 = int_to_ptr.vmem [resolvable:$false] %s1962_s9 }
  0x1d   : > { %s1964_s15 = scalar_lea.vmem %s1963_s9, 256  ;;  %p1965_p13 = scmp.lt.s32.totalorder %s2158_s26, %s1963_s9 }
  0x1e   : > { %p1960_p6 = pnand %p1958_p5, %p1946_p12  ;;  %p1966_p9 = scmp.lt.s32.totalorder %s1964_s15, %s1957_s7 }
  0x20   : > { %p1961_p11 = pneg %p1960_p6  ;;  %p1967_p10 = por %p1966_p9, %p1965_p13 }
  0x22   : > { %p1968_p1 = pnand %p1967_p10, %p1961_p11 }
  0x24   : > { %1971 = shalt.err (!%p1968_p1)
}
  0x25   : > { %1654 = dma.hbm_to_vmem [thread:$0]  (!%p2160_p8), %s2156_s24, 128, %s2158_s26, %s115_s28  }
  0x26   : > { %p2509_p0 = scmp.lt.s32.totalorder %s2062_s12, 3  ;;  %p2510_p2 = scmp.ge.s32.totalorder %s2062_s12, 1 }
  0x27   : > { %s1571_s20 = sshll.u32 %s2149_s19, 4  ;;  %s1585_s21 = sshll.u32 %s2062_s12, 8 }
  0x28   : > { %p2195_p3 = pnand %p2510_p2, %p2509_p0  ;;  %s2204_s25 = scalar_lea.hbm %s2504_s1, %s1585_s21 }
  0x29   : > { %s136_s29 = scalar_lea.vmem [#allocation4], %s1571_s20  ;;  %s133_s24 = scalar_lea.sflag [#allocation5], %s2149_s19 }
  0x2a   : > { %s143_s30 = sshll.u32 %s136_s29, 4  ;;  %s1972_s26 = scalar_lea.hbm %s2204_s25, 256  ;;  %s2206_s30 = int_to_ptr.vmem [resolvable:$true] %s143_s30 }
  0x2b   : > { %p1973_p9 = scmp.ne.s32.totalorder %s2204_s25, %s1972_s26  ;;  %s1977_s3 = scalar_lea.hbm %s2504_s1, 512 }
  0x2c   : > { %p1978_p5 = scmp.lt.s32.totalorder %s2204_s25, %s2504_s1  ;;  %p1979_p6 = scmp.lt.s32.totalorder %s1977_s3, %s1972_s26 }
  0x2d   : > { %p1975_p10 = pnand %p1973_p9, %p1946_p12 }
  0x2e   : > { %p1980_p11 = por %p1979_p6, %p1978_p5 }
  0x2f   : > { %p1976_p4 = pneg %p1975_p10 }
  0x31   : > { %p1981_p13 = pnand %p1980_p11, %p1976_p4 }
  0x33   : > { %1984 = shalt.err (!%p1981_p13)
}
  0x34   : > { %s1985_s6 = scalar_lea.vmem %s2206_s30, 256  ;;  %s2089_s7 = smov [#allocation4]  }
  0x35   : > { %p1986_p1 = scmp.ne.s32.totalorder %s2206_s30, %s1985_s6  ;;  %s1990_s8 = sshll.u32 %s2089_s7, 4  ;;  %s1991_s8 = int_to_ptr.vmem [resolvable:$false] %s1990_s8 }
  0x36   : > { %s1992_s9 = scalar_lea.vmem %s1991_s8, 512  ;;  %p1993_p9 = scmp.lt.s32.totalorder %s2206_s30, %s1991_s8 }
  0x37   : > { %p1988_p0 = pnand %p1986_p1, %p1946_p12  ;;  %p1994_p10 = scmp.lt.s32.totalorder %s1992_s9, %s1985_s6 }
  0x39   : > { %p1989_p2 = pneg %p1988_p0  ;;  %p1995_p7 = por %p1994_p10, %p1993_p9 }
  0x3b   : > { %p1996_p5 = pnand %p1995_p7, %p1989_p2 }
  0x3d   : > { %1999 = shalt.err (!%p1996_p5)
}
  0x3e   : > { %s2090_s15 = smov 128   ;;  %s2091_s20 = smov 8  }
  0x3f   : > { %1657 = dma.hbm_to_vmem [thread:$0]  (!%p2160_p8), %s2204_s25, 256, %s2206_s30, %s133_s24, %s2090_s15, %s2090_s15, %s2091_s20  }
  0x40   : > { %155 = sbr.rel (%p2195_p3) target bundleno = 4487 (0x1187), region = 28  ;;  %s157_s21 = sand.u32 (!%p2195_p3), 1, %s2054_s10  }
  0x41   : > { %s1575_s22 = sshll.u32 (!%p2195_p3), %s157_s21, 3  ;;  %s158_s23 = scalar_lea.sflag (!%p2195_p3), [#allocation3], %s157_s21 }
  0x42   : > { %s161_s29 = scalar_lea.vmem (!%p2195_p3), [#allocation2], %s1575_s22  ;;  %p2512_p7 = scmp.ne.s32.totalorder (!%p2195_p3), %s2507_s18, 0 }
  0x45   : > { %2041 = dma.done.wait (%p2512_p7), %s158_s23, 128  }
  0x46   : > { %2043 = vsyncadd (%p2512_p7), %s158_s23, 4294967168  ;;  %s1576_s26 = sshll.u32 %s157_s21, 4  ;;  %s167_s12 = scalar_lea.sflag [#allocation5], %s157_s21 }
  0x47   : > { %s170_s27 = scalar_lea.vmem [#allocation4], %s1576_s26 }
  0x48   : > { %2045 = dma.done.wait (%p2512_p7), %s167_s12, 256  }
  0x49   : > { %2047 = vsyncadd (%p2512_p7), %s167_s12, 4294967040  ;;  %vm204_vm0 = vcmask 261120   ;;  %v201_v0 = vld [vmem:[%s161_s29] sm:$0xff]  ;;  %v202_v2 = vld [vmem:[%s170_s27] sm:$0xff]  ;;  %p196_p8 = scmp.lt.s32.totalorder %s2127_s13, 1  ;;  %v728_v36 = vlaneseq  ;;  %vm755_vm1 = vcmask 64512  }
  0x4a   : > { %v203_v1 = vld [vmem:[%s170_s27 + $0x8] sm:$0xff]  ;;  %v205_v3 = vsel %vm204_vm0, %v201_v0, inf  ;;  %v209_v5 = vsel %vm204_vm0, %v202_v2, inf  ;;  %s2274_s30 = smov 0.125   ;;  %s2276_s24 = smov 0  }
  0x4b   : > { %v212_v4 = vsel %vm204_vm0, %v203_v1, inf  ;;  %206 = vmin.xlane.f32.xlu0 %v205_v3  ;;  %s2523_s13 = smov (!%p196_p8, %s2127_s13), 1  ;;  %v729_v41 = vand.u32 127, %v728_v36  ;;  %v731_v42 = vshrl.u32 %v728_v36, 7 }
  0x4c   : > { %213 = vmin.xlane.f32.xlu1 %v212_v4  ;;  %s1586_s19 = sshll.u32 %s2523_s13, 4  ;;  %s2272_s13 = smov 0.0625  }
  0x4d   : > { %s2252_s25 = scalar_lea.vmem %s2505_s2, %s1586_s19  ;;  %v732_v51 = vsub.s32 %v729_v41, %v731_v42 }
  0x4f   : > { %210 = vmin.xlane.f32.xlu0 %v209_v5 }
  0xd4   : > { %v207_v6 = vpop.xlane.xlu0 %206 }
  0xd5   : > { %v214_v7 = vpop.xlane.xlu1 %213  ;;  %v208_v8 = vsub.f32 %v201_v0, %v207_v6 }
  0xd6   : > { %v216_v9 = vsub.f32 %v203_v1, %v214_v7 }
  0xd7   : > { %v236_v10 = vsel %vm204_vm0, %v208_v8, 0  ;;  %v217_v12 = vmul.f32 %v208_v8, %v208_v8 }
  0xd8   : > { %v233_v11 = vsel %vm204_vm0, %v216_v9, 0  ;;  %v222_v13 = vmul.f32 %v216_v9, %v216_v9  ;;  %v269_v14 = vand.u32 4294901760, %v236_v10  ;;  %v211_v16 = vpop.xlane.xlu0 %210 }
  0xd9   : > { %v314_v15 = vand.u32 4294901760, %v233_v11  ;;  %v215_v17 = vsub.f32 %v202_v2, %v211_v16  ;;  %v218_v18 = vsel %vm204_vm0, %v217_v12, 0.0 }
  0xda   : > { %v356_v19 = vsub.f32 %v236_v10, %v269_v14  ;;  %1605 = vmatprep.subr.mxu0 %v269_v14  ;;  %219 = vadd.xlane.f32.xlu1 %v218_v18  ;;  %v226_v22 = vsel %vm204_vm0, %v222_v13, 0.0 }
  0xdb   : > { %v315_v20 = vsub.f32 %v233_v11, %v314_v15  ;;  %v230_v21 = vsel %vm204_vm0, %v215_v17, 0  ;;  %1606 = vmatpush3.xpose.msra.mxu0 %v269_v14  ;;  %v221_v23 = vmul.f32 %v215_v17, %v215_v17 }
  0xdc   : > { %v304_v24 = vand.u32 4294901760, %v230_v21  ;;  %1615 = vmatprep.subr.mxu0 %v356_v19  ;;  %v357_v25 = vand.u32 4294901760, %v356_v19 }
  0xdd   : > { %v223_v26 = vsel %vm204_vm0, %v221_v23, 0.0  ;;  %v316_v27 = vand.u32 4294901760, %v315_v20 }
  0xde   : > { %v305_v28 = vsub.f32 %v230_v21, %v304_v24  ;;  %227 = vadd.xlane.f32.xlu1 %v226_v22  ;;  %1612 = vmatprep.mubr.f32.mxu1 %v304_v24  ;;  %v358_v29 = vsub.f32 %v356_v19, %v357_v25 }
  0xdf   : > { %224 = vadd.xlane.f32.xlu0 %v223_v26  ;;  %v317_v32 = vsub.f32 %v315_v20, %v316_v27 }
  0xe0   : > { %v359_v30 = vand.u32 4294901760, %v358_v29  ;;  %v306_v31 = vand.u32 4294901760, %v305_v28 }
  0xe1   : > { %v318_v35 = vand.u32 4294901760, %v317_v32  ;;  %v2268_v32 = vmov 0.0625  }
  0xe2   : > { %1610 = vmatprep.subr.mxu1 %v359_v30  ;;  %v307_v33 = vsub.f32 %v305_v28, %v306_v31 }
  0xe3   : > { %1611 = vmatpush3.xpose.msra.mxu1 %v359_v30 }
  0xe4   : > { %1620 = vmatprep.subr.mxu1 %v269_v14  ;;  %v308_v34 = vand.u32 4294901760, %v307_v33  ;;  %v2270_v33 = vmov 0.125  }
  0xe6   : > { %1607 = vmatprep.mubr.f32.mxu0 %v308_v34  ;;  %1613 = vmatmul.mubr.f32.vlgmr.msra.gmra.mxu1 %v314_v15 }
  0xe7   : > { %1608 = vmatmul.mubr.f32.vlgmr.msra.gmra.mxu0 %v318_v35  ;;  %1621 = vmatpush3.xpose.msra.mxu1 %v269_v14 }
  0xe8   : > { %1616 = vmatpush3.xpose.msra.mxu0 %v356_v19  ;;  %1622 = vmatprep.mubr.f32.mxu1 %v306_v31  ;;  %v2266_v31 = vmov 0.0625  }
  0xe9   : > { %1617 = vmatprep.mubr.f32.mxu0 %v305_v28  ;;  %1625 = vmatprep.subr.mxu0 %v357_v25 }
  0xea   : > { %1630 = vmatprep.subr.mxu1 %v269_v14  ;;  %1623 = vmatmul.mubr.f32.vlgmr.msra.gmra.mxu1 %v316_v27 }
  0xeb   : > { %1618 = vmatmul.mubr.f32.vlgmr.msra.gmra.mxu0 %v315_v20  ;;  %1631 = vmatpush3.xpose.msra.mxu1 %v269_v14 }
  0xec   : > { %1626 = vmatpush3.xpose.msra.mxu0 %v357_v25  ;;  %1632 = vmatprep.mubr.f32.mxu1 %v304_v24 }
  0xed   : > { %1627 = vmatprep.mubr.f32.mxu0 %v304_v24 }
  0xee   : > { %1633 = vmatmul.mubr.f32.vlgmr.msra.gmra.mxu1 %v314_v15 }
  0xef   : > { %1628 = vmatmul.mubr.f32.vlgmr.msra.gmra.mxu0 %v314_v15 }
 0x163   : > { %v220_v45 = vpop.xlane.xlu1 %219 }
 0x164   : > { %v733_v60 = vrot.slane %v220_v45, %v732_v51 }
 0x167   : > { %v228_v58 = vpop.xlane.xlu1 %227 }
 0x168   : > { %v225_v63 = vpop.xlane.xlu0 %224  ;;  %v748_v1 = vadd.f32 %v733_v60, %v228_v58 }
 0x169   : > { %v747_v4 = vadd.f32 %v733_v60, %v225_v63 }
 0x1a6   : > { %v1614_v37 = vpop.f32.mrf.mxu1 }
 0x1a7   : > { %v1609_v38 = vpop.f32.mrf.mxu0 }
 0x1a8   : > { %v396_v39 = vpop.f32.mrf.mxu1  ;;  %v403_v43 = vadd.f32 %v1614_v37, %v1609_v38 }
 0x1a9   : > { %v310_v40 = vpop.f32.mrf.mxu0 }
 0x1aa   : > { %v1624_v44 = vpop.f32.mrf.mxu1  ;;  %v397_v47 = vadd.f32 %v396_v39, %v310_v40 }
 0x1ab   : > { %v1619_v46 = vpop.f32.mrf.mxu0 }
 0x1ac   : > { %v484_v48 = vadd.f32 %v1619_v46, %v403_v43  ;;  %v557_v49 = vpop.f32.mrf.mxu1 }
 0x1ad   : > { %v476_v50 = vpop.f32.mrf.mxu0 }
 0x1ae   : > { %v477_v52 = vadd.f32 %v476_v50, %v397_v47  ;;  %v566_v53 = vadd.f32 %v1624_v44, %v484_v48  ;;  %v1634_v54 = vpop.f32.mrf.mxu1 }
 0x1af   : > { %v1629_v55 = vpop.f32.mrf.mxu0 }
 0x1b0   : > { %v646_v56 = vadd.f32 %v1629_v55, %v566_v53  ;;  %v558_v57 = vadd.f32 %v557_v49, %v477_v52  ;;  %v717_v0 = vpop.f32.mrf.mxu1 }
 0x1b1   : > { %v639_v59 = vpop.f32.mrf.mxu0 }
 0x1b2   : > { %v724_v61 = vadd.f32 %v1634_v54, %v646_v56  ;;  %v640_v62 = vadd.f32 %v639_v59, %v558_v57 }
 0x1b4   : > { %v750_v2 = vmul.f32 2.0, %v724_v61  ;;  %v718_v3 = vadd.f32 %v717_v0, %v640_v62 }
 0x1b6   : > { %v749_v5 = vmul.f32 2.0, %v718_v3  ;;  %v752_v6 = vsub.f32 %v748_v1, %v750_v2 }
 0x1b8   : > { %v754_v7 = vmax.f32 %v752_v6, 0.0  ;;  %v751_v8 = vsub.f32 %v747_v4, %v749_v5 }
 0x1ba   : > { %v759_v9 = vsel %vm755_vm1, %v754_v7, -inf  ;;  %v753_v10 = vmax.f32 %v751_v8, 0.0 }
 0x1bb   : > { %760 = vmax.xlane.f32.xlu1 %v759_v9 }
 0x1bc   : > { %v756_v11 = vsel %vm755_vm1, %v753_v10, -inf }
 0x1bd   : > { %757 = vmax.xlane.f32.xlu0 %v756_v11 }
 0x244   : > { %v761_v12 = vpop.xlane.xlu1 %760 }
 0x246   : > { %v758_v13 = vpop.xlane.xlu0 %757 }
 0x247   : > { %v762_v14 = vmax.f32 %v758_v13, %v761_v12 }
 0x249   : > { %v763_v15 = vrot.slane %v762_v14, 4 }
 0x24b   : > { %v764_v16 = vmax.f32 %v762_v14, %v763_v15 }
 0x24d   : > { %v765_v17 = vrot.slane %v764_v16, 2 }
 0x24f   : > { %v766_v18 = vmax.f32 %v764_v16, %v765_v17 }
 0x251   : > { %v767_v19 = vrot.slane %v766_v18, 1 }
 0x253   : > { %v768_v20 = vmax.f32 %v766_v18, %v767_v19 }
 0x255   : > { %vm769_vm2 = vcmp.gt.f32.partialorder %v768_v20, 0.0 }
 0x256   : > { %v770_v21 = vsel %vm769_vm2, %v768_v20, 1.0 }
 0x257   : > { %v771_v22 = vmul.f32 0.1, %v770_v21 }
 0x259   : > { %1742 = vrcp.f32 %v771_v22 }
 0x266   : > { %v1743_v23 = vpop.eup %1742 }
 0x267   : > { %v773_v24 = vmul.f32 -1.0, %v1743_v23 }
 0x269   : > { %v774_v25 = vmul.f32 %v773_v24, %v753_v10  ;;  %v775_v26 = vmul.f32 %v773_v24, %v754_v7 }
 0x26b   : > { %v776_v27 = vmul.f32 1.442695, %v774_v25  ;;  %v778_v28 = vmul.f32 1.442695, %v775_v26 }
 0x26d   : > { %1744 = vpow2.f32 %v776_v27 }
 0x26e   : > { %1746 = vpow2.f32 %v778_v28 }
 0x27a   : > { %v2262_v29 = vpop.eup %1744 }
 0x27b   : > { %v2264_v30 = vpop.eup %1746 }
 0x27c LB: >> { %v794_v34 = vmul.f32 %v2070_v32, %v2262_v29  ;;  %v795_v35 = vmul.f32 %v2066_v31, %v2264_v30  ;;  %s1446_s28 = sadd.s32 1, %s2086_s24   ;;  %s2092_s5 = smov 1.0   ;;  %s2086_s24 = sphi %s2276_s24, %s2517_s24   ;;  %s2082_s30 = sphi %s2274_s30, %s2525_s30   ;;  %s2078_s13 = sphi %s2272_s13, %s2527_s13   ;;  %v2074_v33 = vphi %v2270_v33, %v2516_v33   ;;  %v2070_v32 = vphi %v2268_v32, %v2515_v32   ;;  %v2066_v31 = vphi %v2266_v31, %v2514_v31  }
 0x27d   : >> { %p788_p6 = scmp.lt.s32.totalorder %s1446_s28, 63  ;;  %s2517_s24 = smov %s1446_s28 }
 0x27e   : >> { %v796_v36 = vsel %vm755_vm1, %v794_v34, 0.0  ;;  %v797_v37 = vsel %vm755_vm1, %v795_v35, 0.0 }
 0x27f   : >> { %v798_v38 = vadd.f32 %v797_v37, %v796_v36 }
 0x281   : >> { %v799_v39 = vrot.slane %v798_v38, 4 }
 0x283   : >> { %v800_v40 = vadd.f32 %v799_v39, %v798_v38 }
 0x285   : >> { %v801_v41 = vrot.slane %v800_v40, 2 }
 0x287   : >> { %v802_v42 = vadd.f32 %v801_v41, %v800_v40 }
 0x289   : >> { %v803_v43 = vrot.slane %v802_v42, 1 }
 0x28b   : >> { %v804_v44 = vadd.f32 %v803_v43, %v802_v42 }
 0x28d   : >> { %1748 = vlog2.f32 %v804_v44 }
 0x29a   : >> { %v1749_v45 = vpop.eup %1748 }
 0x29b   : >> { %v806_v46 = vmul.f32 0.6931472, %v1749_v45 }
 0x29d   : >> { %v807_v47 = vmul.f32 0.8333333, %v806_v46 }
 0x29f   : >> { %v808_v48 = vsub.f32 -1.732868, %v807_v47 }
 0x2a1   : >> { %v809_v49 = vmul.f32 1.442695, %v808_v48 }
 0x2a3   : >> { %1750 = vpow2.f32 %v809_v49 }
 0x2b0   : >> { %v1751_v50 = vpop.eup %1750 }
 0x2b1   : >> { %v811_v51 = vmul.f32 %v1751_v50, %v2262_v29  ;;  %v812_v52 = vmul.f32 %v1751_v50, %v2264_v30 }
 0x2b3   : >> { %v813_v53 = vsel %vm755_vm1, %v811_v51, 0.0  ;;  %v816_v54 = vsel %vm755_vm1, %v812_v52, 0.0 }
 0x2b4   : >> { %814 = vadd.xlane.f32.xlu0 %v813_v53 }
 0x2b8   : >> { %817 = vadd.xlane.f32.xlu0 %v816_v54 }
 0x33d   : >> { %v815_v55 = vpop.xlane.xlu0 %814 }
 0x33e   : >> { %1752 = vlog2.f32 %v815_v55 }
 0x341   : >> { %v818_v56 = vpop.xlane.xlu0 %817 }
 0x342   : >> { %1754 = vlog2.f32 %v818_v56 }
 0x34b   : >> { %v1753_v57 = vpop.eup %1752 }
 0x34c   : >> { %v820_v58 = vmul.f32 0.6931472, %v1753_v57 }
 0x34e   : >> { %v823_v59 = vmul.f32 0.8333333, %v820_v58 }
 0x34f   : >> { %v1755_v60 = vpop.eup %1754 }
 0x350   : >> { %v825_v61 = vsub.f32 -2.3104906, %v823_v59  ;;  %v822_v62 = vmul.f32 0.6931472, %v1755_v60 }
 0x352   : >> { %v827_v63 = vmul.f32 1.442695, %v825_v61  ;;  %v824_v0 = vmul.f32 0.8333333, %v822_v62 }
 0x354   : >> { %1756 = vpow2.f32 %v827_v63  ;;  %v826_v1 = vsub.f32 -2.3104906, %v824_v0 }
 0x356   : >> { %v829_v2 = vmul.f32 1.442695, %v826_v1 }
 0x358   : >> { %1758 = vpow2.f32 %v829_v2 }
 0x361   : >> { %v1757_v3 = vpop.eup %1756 }
 0x362   : >> { %v831_v4 = vmul.f32 %v1757_v3, %v2262_v29 }
 0x364   : >> { %v833_v7 = vsel %vm755_vm1, %v831_v4, 0.0 }
 0x365   : >> { %v1759_v5 = vpop.eup %1758 }
 0x366   : >> { %v832_v6 = vmul.f32 %v1759_v5, %v2264_v30 }
 0x368   : >> { %v834_v8 = vsel %vm755_vm1, %v832_v6, 0.0 }
 0x369   : >> { %v835_v9 = vadd.f32 %v834_v8, %v833_v7 }
 0x36b   : >> { %v836_v10 = vrot.slane %v835_v9, 4 }
 0x36d   : >> { %v837_v11 = vadd.f32 %v836_v10, %v835_v9 }
 0x36f   : >> { %v838_v12 = vrot.slane %v837_v11, 2 }
 0x371   : >> { %v839_v13 = vadd.f32 %v838_v12, %v837_v11 }
 0x373   : >> { %v840_v14 = vrot.slane %v839_v13, 1 }
 0x375   : >> { %v841_v15 = vadd.f32 %v840_v14, %v839_v13 }
 0x377   : >> { %1760 = vlog2.f32 %v841_v15 }
 0x384   : >> { %v1761_v16 = vpop.eup %1760 }
 0x385   : >> { %v843_v17 = vmul.f32 0.6931472, %v1761_v16 }
 0x387   : >> { %v844_v18 = vmul.f32 0.8333333, %v843_v17 }
 0x389   : >> { %v845_v19 = vsub.f32 -1.732868, %v844_v18 }
 0x38b   : >> { %v846_v20 = vmul.f32 1.442695, %v845_v19 }
 0x38d   : >> { %1762 = vpow2.f32 %v846_v20 }
 0x39a   : >> { %v1763_v21 = vpop.eup %1762 }
 0x39b   : >> { %v848_v22 = vmul.f32 %v1763_v21, %v2262_v29  ;;  %v849_v24 = vmul.f32 %v1763_v21, %v2264_v30 }
 0x39d   : >> { %v850_v23 = vsel %vm755_vm1, %v848_v22, 0.0  ;;  %v853_v25 = vsel %vm755_vm1, %v849_v24, 0.0 }
 0x39e   : >> { %851 = vadd.xlane.f32.xlu1 %v850_v23 }
 0x3a2   : >> { %854 = vadd.xlane.f32.xlu1 %v853_v25 }
 0x427   : >> { %v852_v26 = vpop.xlane.xlu1 %851 }
 0x428   : >> { %1764 = vlog2.f32 %v852_v26 }
 0x42b   : >> { %v855_v27 = vpop.xlane.xlu1 %854 }
 0x42c   : >> { %1766 = vlog2.f32 %v855_v27 }
 0x435   : >> { %v1765_v28 = vpop.eup %1764 }
 0x436   : >> { %v857_v34 = vmul.f32 0.6931472, %v1765_v28 }
 0x438   : >> { %v860_v35 = vmul.f32 0.8333333, %v857_v34 }
 0x439   : >> { %v1767_v36 = vpop.eup %1766 }
 0x43a   : >> { %v862_v37 = vsub.f32 -2.3104906, %v860_v35  ;;  %v859_v38 = vmul.f32 0.6931472, %v1767_v36 }
 0x43c   : >> { %v864_v39 = vmul.f32 1.442695, %v862_v37  ;;  %v861_v40 = vmul.f32 0.8333333, %v859_v38 }
 0x43e   : >> { %1768 = vpow2.f32 %v864_v39  ;;  %v863_v41 = vsub.f32 -2.3104906, %v861_v40 }
 0x440   : >> { %v866_v42 = vmul.f32 1.442695, %v863_v41 }
 0x442   : >> { %1770 = vpow2.f32 %v866_v42 }
 0x44b   : >> { %v1769_v43 = vpop.eup %1768 }
 0x44c   : >> { %v868_v44 = vmul.f32 %v1769_v43, %v2262_v29 }
 0x44e   : >> { %v870_v47 = vsel %vm755_vm1, %v868_v44, 0.0 }
 0x44f   : >> { %v1771_v45 = vpop.eup %1770 }
 0x450   : >> { %v869_v46 = vmul.f32 %v1771_v45, %v2264_v30 }
 0x452   : >> { %v871_v48 = vsel %vm755_vm1, %v869_v46, 0.0 }
 0x453   : >> { %v872_v49 = vadd.f32 %v871_v48, %v870_v47 }
 0x455   : >> { %v873_v50 = vrot.slane %v872_v49, 4 }
 0x457   : >> { %v874_v51 = vadd.f32 %v873_v50, %v872_v49 }
 0x459   : >> { %v875_v52 = vrot.slane %v874_v51, 2 }
 0x45b   : >> { %v876_v53 = vadd.f32 %v875_v52, %v874_v51 }
 0x45d   : >> { %v877_v54 = vrot.slane %v876_v53, 1 }
 0x45f   : >> { %v878_v55 = vadd.f32 %v877_v54, %v876_v53 }
 0x461   : >> { %1772 = vlog2.f32 %v878_v55 }
 0x46e   : >> { %v1773_v56 = vpop.eup %1772 }
 0x46f   : >> { %v880_v57 = vmul.f32 0.6931472, %v1773_v56 }
 0x471   : >> { %v881_v58 = vmul.f32 0.8333333, %v880_v57 }
 0x473   : >> { %v882_v59 = vsub.f32 -1.732868, %v881_v58 }
 0x475   : >> { %v883_v60 = vmul.f32 1.442695, %v882_v59 }
 0x477   : >> { %1774 = vpow2.f32 %v883_v60 }
 0x484   : >> { %v1775_v61 = vpop.eup %1774 }
 0x485   : >> { %v886_v62 = vmul.f32 %v1775_v61, %v2264_v30  ;;  %v885_v63 = vmul.f32 %v1775_v61, %v2262_v29 }
 0x487   : >> { %v890_v0 = vsel %vm755_vm1, %v886_v62, 0.0  ;;  %v887_v1 = vsel %vm755_vm1, %v885_v63, 0.0 }
 0x488   : >> { %891 = vadd.xlane.f32.xlu1 %v890_v0  ;;  %888 = vadd.xlane.f32.xlu0 %v887_v1 }
 0x511   : >> { %v892_v2 = vpop.xlane.xlu1 %891  ;;  %v889_v3 = vpop.xlane.xlu0 %888 }
 0x512   : >> { %1776 = vlog2.f32 %v892_v2 }
 0x513   : >> { %1778 = vlog2.f32 %v889_v3 }
 0x51f   : >> { %v1777_v4 = vpop.eup %1776 }
 0x520   : >> { %v1779_v5 = vpop.eup %1778  ;;  %v896_v6 = vmul.f32 0.6931472, %v1777_v4 }
 0x521   : >> { %v894_v7 = vmul.f32 0.6931472, %v1779_v5 }
 0x522   : >> { %v898_v8 = vmul.f32 0.8333333, %v896_v6 }
 0x523   : >> { %v897_v9 = vmul.f32 0.8333333, %v894_v7 }
 0x524   : >> { %v900_v10 = vsub.f32 -2.3104906, %v898_v8 }
 0x525   : >> { %v899_v11 = vsub.f32 -2.3104906, %v897_v9 }
 0x526   : >> { %v903_v12 = vmul.f32 1.442695, %v900_v10 }
 0x527   : >> { %v901_v13 = vmul.f32 1.442695, %v899_v11 }
 0x528   : >> { %1780 = vpow2.f32 %v903_v12 }
 0x529   : >> { %1782 = vpow2.f32 %v901_v13 }
 0x535   : >> { %v1781_v14 = vpop.eup %1780 }
 0x536   : >> { %v1783_v15 = vpop.eup %1782  ;;  %v906_v16 = vmul.f32 %v1781_v14, %v2264_v30 }
 0x537   : >> { %v905_v17 = vmul.f32 %v1783_v15, %v2262_v29 }
 0x538   : >> { %v908_v18 = vsel %vm755_vm1, %v906_v16, 0.0 }
 0x539   : >> { %v907_v19 = vsel %vm755_vm1, %v905_v17, 0.0 }
 0x53a   : >> { %v909_v20 = vadd.f32 %v908_v18, %v907_v19 }
 0x53c   : >> { %v910_v21 = vrot.slane %v909_v20, 4 }
 0x53e   : >> { %v911_v22 = vadd.f32 %v910_v21, %v909_v20 }
 0x540   : >> { %v912_v23 = vrot.slane %v911_v22, 2 }
 0x542   : >> { %v913_v24 = vadd.f32 %v912_v23, %v911_v22 }
 0x544   : >> { %v914_v25 = vrot.slane %v913_v24, 1 }
 0x546   : >> { %v915_v26 = vadd.f32 %v914_v25, %v913_v24 }
 0x548   : >> { %1784 = vlog2.f32 %v915_v26 }
 0x555   : >> { %v1785_v27 = vpop.eup %1784 }
 0x556   : >> { %v917_v28 = vmul.f32 0.6931472, %v1785_v27 }
 0x558   : >> { %v918_v34 = vmul.f32 0.8333333, %v917_v28 }
 0x55a   : >> { %v919_v35 = vsub.f32 -1.732868, %v918_v34 }
 0x55c   : >> { %v920_v36 = vmul.f32 1.442695, %v919_v35 }
 0x55e   : >> { %1786 = vpow2.f32 %v920_v36 }
 0x56b   : >> { %v1787_v37 = vpop.eup %1786 }
 0x56c   : >> { %v923_v38 = vmul.f32 %v1787_v37, %v2264_v30  ;;  %v922_v39 = vmul.f32 %v1787_v37, %v2262_v29 }
 0x56e   : >> { %v927_v40 = vsel %vm755_vm1, %v923_v38, 0.0  ;;  %v924_v41 = vsel %vm755_vm1, %v922_v39, 0.0 }
 0x56f   : >> { %928 = vadd.xlane.f32.xlu1 %v927_v40  ;;  %925 = vadd.xlane.f32.xlu0 %v924_v41 }
 0x5f8   : >> { %v929_v42 = vpop.xlane.xlu1 %928  ;;  %v926_v43 = vpop.xlane.xlu0 %925 }
 0x5f9   : >> { %1788 = vlog2.f32 %v929_v42 }
 0x5fa   : >> { %1790 = vlog2.f32 %v926_v43 }
 0x606   : >> { %v1789_v44 = vpop.eup %1788 }
 0x607   : >> { %v1791_v45 = vpop.eup %1790  ;;  %v933_v46 = vmul.f32 0.6931472, %v1789_v44 }
 0x608   : >> { %v931_v47 = vmul.f32 0.6931472, %v1791_v45 }
 0x609   : >> { %v935_v48 = vmul.f32 0.8333333, %v933_v46 }
 0x60a   : >> { %v934_v49 = vmul.f32 0.8333333, %v931_v47 }
 0x60b   : >> { %v937_v50 = vsub.f32 -2.3104906, %v935_v48 }
 0x60c   : >> { %v936_v51 = vsub.f32 -2.3104906, %v934_v49 }
 0x60d   : >> { %v940_v52 = vmul.f32 1.442695, %v937_v50 }
 0x60e   : >> { %v938_v53 = vmul.f32 1.442695, %v936_v51 }
 0x60f   : >> { %1792 = vpow2.f32 %v940_v52 }
 0x610   : >> { %1794 = vpow2.f32 %v938_v53 }
 0x61c   : >> { %v1793_v54 = vpop.eup %1792 }
 0x61d   : >> { %v1795_v55 = vpop.eup %1794  ;;  %v943_v56 = vmul.f32 %v1793_v54, %v2264_v30 }
 0x61e   : >> { %v942_v57 = vmul.f32 %v1795_v55, %v2262_v29 }
 0x61f   : >> { %v945_v58 = vsel %vm755_vm1, %v943_v56, 0.0 }
 0x620   : >> { %v944_v59 = vsel %vm755_vm1, %v942_v57, 0.0 }
 0x621   : >> { %v946_v60 = vadd.f32 %v945_v58, %v944_v59 }
 0x623   : >> { %v947_v61 = vrot.slane %v946_v60, 4 }
 0x625   : >> { %v948_v62 = vadd.f32 %v947_v61, %v946_v60 }
 0x627   : >> { %v949_v63 = vrot.slane %v948_v62, 2 }
 0x629   : >> { %v950_v0 = vadd.f32 %v949_v63, %v948_v62 }
 0x62b   : >> { %v951_v1 = vrot.slane %v950_v0, 1 }
 0x62d   : >> { %v952_v2 = vadd.f32 %v951_v1, %v950_v0 }
 0x62f   : >> { %1796 = vlog2.f32 %v952_v2 }
 0x63c   : >> { %v1797_v3 = vpop.eup %1796 }
 0x63d   : >> { %v954_v4 = vmul.f32 0.6931472, %v1797_v3 }
 0x63f   : >> { %v955_v5 = vmul.f32 0.8333333, %v954_v4 }
 0x641   : >> { %v956_v6 = vsub.f32 -1.732868, %v955_v5 }
 0x643   : >> { %v957_v7 = vmul.f32 1.442695, %v956_v6 }
 0x645   : >> { %1798 = vpow2.f32 %v957_v7 }
 0x652   : >> { %v1799_v8 = vpop.eup %1798 }
 0x653   : >> { %v960_v9 = vmul.f32 %v1799_v8, %v2264_v30  ;;  %v959_v10 = vmul.f32 %v1799_v8, %v2262_v29 }
 0x655   : >> { %v964_v11 = vsel %vm755_vm1, %v960_v9, 0.0  ;;  %v961_v12 = vsel %vm755_vm1, %v959_v10, 0.0 }
 0x656   : >> { %965 = vadd.xlane.f32.xlu1 %v964_v11  ;;  %962 = vadd.xlane.f32.xlu0 %v961_v12 }
 0x6df   : >> { %v966_v13 = vpop.xlane.xlu1 %965  ;;  %v963_v14 = vpop.xlane.xlu0 %962 }
 0x6e0   : >> { %1800 = vlog2.f32 %v966_v13 }
 0x6e1   : >> { %1802 = vlog2.f32 %v963_v14 }
 0x6ed   : >> { %v1801_v15 = vpop.eup %1800 }
 0x6ee   : >> { %v1803_v16 = vpop.eup %1802  ;;  %v970_v17 = vmul.f32 0.6931472, %v1801_v15 }
 0x6ef   : >> { %v968_v18 = vmul.f32 0.6931472, %v1803_v16 }
 0x6f0   : >> { %v972_v19 = vmul.f32 0.8333333, %v970_v17 }
 0x6f1   : >> { %v971_v20 = vmul.f32 0.8333333, %v968_v18 }
 0x6f2   : >> { %v974_v21 = vsub.f32 -2.3104906, %v972_v19 }
 0x6f3   : >> { %v973_v22 = vsub.f32 -2.3104906, %v971_v20 }
 0x6f4   : >> { %v977_v23 = vmul.f32 1.442695, %v974_v21 }
 0x6f5   : >> { %v975_v24 = vmul.f32 1.442695, %v973_v22 }
 0x6f6   : >> { %1804 = vpow2.f32 %v977_v23 }
 0x6f7   : >> { %1806 = vpow2.f32 %v975_v24 }
 0x703   : >> { %v1805_v25 = vpop.eup %1804 }
 0x704   : >> { %v1807_v26 = vpop.eup %1806  ;;  %v980_v27 = vmul.f32 %v1805_v25, %v2264_v30 }
 0x705   : >> { %v979_v28 = vmul.f32 %v1807_v26, %v2262_v29 }
 0x706   : >> { %v982_v34 = vsel %vm755_vm1, %v980_v27, 0.0 }
 0x707   : >> { %v981_v35 = vsel %vm755_vm1, %v979_v28, 0.0 }
 0x708   : >> { %v983_v36 = vadd.f32 %v982_v34, %v981_v35 }
 0x70a   : >> { %v984_v37 = vrot.slane %v983_v36, 4 }
 0x70c   : >> { %v985_v38 = vadd.f32 %v984_v37, %v983_v36 }
 0x70e   : >> { %v986_v39 = vrot.slane %v985_v38, 2 }
 0x710   : >> { %v987_v40 = vadd.f32 %v986_v39, %v985_v38 }
 0x712   : >> { %v988_v41 = vrot.slane %v987_v40, 1 }
 0x714   : >> { %v989_v42 = vadd.f32 %v988_v41, %v987_v40 }
 0x716   : >> { %1808 = vlog2.f32 %v989_v42 }
 0x723   : >> { %v1809_v43 = vpop.eup %1808 }
 0x724   : >> { %v991_v44 = vmul.f32 0.6931472, %v1809_v43 }
 0x726   : >> { %v992_v45 = vmul.f32 0.8333333, %v991_v44 }
 0x728   : >> { %v993_v46 = vsub.f32 -1.732868, %v992_v45 }
 0x72a   : >> { %v994_v47 = vmul.f32 1.442695, %v993_v46 }
 0x72c   : >> { %1810 = vpow2.f32 %v994_v47 }
 0x739   : >> { %v1811_v48 = vpop.eup %1810 }
 0x73a   : >> { %v997_v49 = vmul.f32 %v1811_v48, %v2264_v30  ;;  %v996_v50 = vmul.f32 %v1811_v48, %v2262_v29 }
 0x73c   : >> { %v1001_v51 = vsel %vm755_vm1, %v997_v49, 0.0  ;;  %v998_v52 = vsel %vm755_vm1, %v996_v50, 0.0 }
 0x73d   : >> { %1002 = vadd.xlane.f32.xlu1 %v1001_v51  ;;  %999 = vadd.xlane.f32.xlu0 %v998_v52 }
 0x7c6   : >> { %v1003_v53 = vpop.xlane.xlu1 %1002  ;;  %v1000_v54 = vpop.xlane.xlu0 %999 }
 0x7c7   : >> { %1812 = vlog2.f32 %v1003_v53 }
 0x7c8   : >> { %1814 = vlog2.f32 %v1000_v54 }
 0x7d4   : >> { %v1813_v55 = vpop.eup %1812 }
 0x7d5   : >> { %v1815_v56 = vpop.eup %1814  ;;  %v1007_v57 = vmul.f32 0.6931472, %v1813_v55 }
 0x7d6   : >> { %v1005_v58 = vmul.f32 0.6931472, %v1815_v56 }
 0x7d7   : >> { %v1009_v59 = vmul.f32 0.8333333, %v1007_v57 }
 0x7d8   : >> { %v1008_v60 = vmul.f32 0.8333333, %v1005_v58 }
 0x7d9   : >> { %v1011_v61 = vsub.f32 -2.3104906, %v1009_v59 }
 0x7da   : >> { %v1010_v62 = vsub.f32 -2.3104906, %v1008_v60 }
 0x7db   : >> { %v1014_v63 = vmul.f32 1.442695, %v1011_v61 }
 0x7dc   : >> { %v1012_v0 = vmul.f32 1.442695, %v1010_v62 }
 0x7dd   : >> { %1816 = vpow2.f32 %v1014_v63 }
 0x7de   : >> { %1818 = vpow2.f32 %v1012_v0 }
 0x7ea   : >> { %v1817_v1 = vpop.eup %1816 }
 0x7eb   : >> { %v1819_v2 = vpop.eup %1818  ;;  %v1017_v3 = vmul.f32 %v1817_v1, %v2264_v30 }
 0x7ec   : >> { %v1016_v4 = vmul.f32 %v1819_v2, %v2262_v29 }
 0x7ed   : >> { %v1019_v5 = vsel %vm755_vm1, %v1017_v3, 0.0 }
 0x7ee   : >> { %v1018_v6 = vsel %vm755_vm1, %v1016_v4, 0.0 }
 0x7ef   : >> { %v1020_v7 = vadd.f32 %v1019_v5, %v1018_v6 }
 0x7f1   : >> { %v1021_v8 = vrot.slane %v1020_v7, 4 }
 0x7f3   : >> { %v1022_v9 = vadd.f32 %v1021_v8, %v1020_v7 }
 0x7f5   : >> { %v1023_v10 = vrot.slane %v1022_v9, 2 }
 0x7f7   : >> { %v1024_v11 = vadd.f32 %v1023_v10, %v1022_v9 }
 0x7f9   : >> { %v1025_v12 = vrot.slane %v1024_v11, 1 }
 0x7fb   : >> { %v1026_v13 = vadd.f32 %v1025_v12, %v1024_v11 }
 0x7fd   : >> { %1820 = vlog2.f32 %v1026_v13 }
 0x80a   : >> { %v1821_v14 = vpop.eup %1820 }
 0x80b   : >> { %v1028_v15 = vmul.f32 0.6931472, %v1821_v14 }
 0x80d   : >> { %v1029_v16 = vmul.f32 0.8333333, %v1028_v15 }
 0x80f   : >> { %v1030_v17 = vsub.f32 -1.732868, %v1029_v16 }
 0x811   : >> { %v1031_v18 = vmul.f32 1.442695, %v1030_v17 }
 0x813   : >> { %1822 = vpow2.f32 %v1031_v18 }
 0x820   : >> { %v1823_v19 = vpop.eup %1822 }
 0x821   : >> { %v1034_v20 = vmul.f32 %v1823_v19, %v2264_v30  ;;  %v1033_v21 = vmul.f32 %v1823_v19, %v2262_v29 }
 0x823   : >> { %v1038_v22 = vsel %vm755_vm1, %v1034_v20, 0.0  ;;  %v1035_v23 = vsel %vm755_vm1, %v1033_v21, 0.0 }
 0x824   : >> { %1039 = vadd.xlane.f32.xlu1 %v1038_v22  ;;  %1036 = vadd.xlane.f32.xlu0 %v1035_v23 }
 0x8ad   : >> { %v1040_v24 = vpop.xlane.xlu1 %1039  ;;  %v1037_v25 = vpop.xlane.xlu0 %1036 }
 0x8ae   : >> { %1824 = vlog2.f32 %v1040_v24 }
 0x8af   : >> { %1826 = vlog2.f32 %v1037_v25 }
 0x8bb   : >> { %v1825_v26 = vpop.eup %1824 }
 0x8bc   : >> { %v1827_v27 = vpop.eup %1826  ;;  %v1044_v28 = vmul.f32 0.6931472, %v1825_v26 }
 0x8bd   : >> { %v1042_v34 = vmul.f32 0.6931472, %v1827_v27 }
 0x8be   : >> { %v1046_v35 = vmul.f32 0.8333333, %v1044_v28 }
 0x8bf   : >> { %v1045_v36 = vmul.f32 0.8333333, %v1042_v34 }
 0x8c0   : >> { %v1048_v37 = vsub.f32 -2.3104906, %v1046_v35 }
 0x8c1   : >> { %v1047_v38 = vsub.f32 -2.3104906, %v1045_v36 }
 0x8c2   : >> { %v1051_v39 = vmul.f32 1.442695, %v1048_v37 }
 0x8c3   : >> { %v1049_v40 = vmul.f32 1.442695, %v1047_v38 }
 0x8c4   : >> { %1828 = vpow2.f32 %v1051_v39 }
 0x8c5   : >> { %1830 = vpow2.f32 %v1049_v40 }
 0x8d1   : >> { %v1829_v41 = vpop.eup %1828 }
 0x8d2   : >> { %v1831_v42 = vpop.eup %1830  ;;  %v1054_v43 = vmul.f32 %v1829_v41, %v2264_v30 }
 0x8d3   : >> { %v1053_v44 = vmul.f32 %v1831_v42, %v2262_v29 }
 0x8d4   : >> { %v1056_v45 = vsel %vm755_vm1, %v1054_v43, 0.0 }
 0x8d5   : >> { %v1055_v46 = vsel %vm755_vm1, %v1053_v44, 0.0 }
 0x8d6   : >> { %v1057_v47 = vadd.f32 %v1056_v45, %v1055_v46 }
 0x8d8   : >> { %v1058_v48 = vrot.slane %v1057_v47, 4 }
 0x8da   : >> { %v1059_v49 = vadd.f32 %v1058_v48, %v1057_v47 }
 0x8dc   : >> { %v1060_v50 = vrot.slane %v1059_v49, 2 }
 0x8de   : >> { %v1061_v51 = vadd.f32 %v1060_v50, %v1059_v49 }
 0x8e0   : >> { %v1062_v52 = vrot.slane %v1061_v51, 1 }
 0x8e2   : >> { %v1063_v53 = vadd.f32 %v1062_v52, %v1061_v51 }
 0x8e4   : >> { %1832 = vlog2.f32 %v1063_v53 }
 0x8f1   : >> { %v1833_v54 = vpop.eup %1832 }
 0x8f2   : >> { %v1065_v55 = vmul.f32 0.6931472, %v1833_v54 }
 0x8f4   : >> { %v1066_v56 = vmul.f32 0.8333333, %v1065_v55 }
 0x8f6   : >> { %v1067_v57 = vsub.f32 -1.732868, %v1066_v56 }
 0x8f8   : >> { %v1068_v58 = vmul.f32 1.442695, %v1067_v57 }
 0x8fa   : >> { %1834 = vpow2.f32 %v1068_v58 }
 0x907   : >> { %v1835_v59 = vpop.eup %1834 }
 0x908   : >> { %v1071_v60 = vmul.f32 %v1835_v59, %v2264_v30  ;;  %v1070_v61 = vmul.f32 %v1835_v59, %v2262_v29 }
 0x90a   : >> { %v1075_v62 = vsel %vm755_vm1, %v1071_v60, 0.0  ;;  %v1072_v63 = vsel %vm755_vm1, %v1070_v61, 0.0 }
 0x90b   : >> { %1076 = vadd.xlane.f32.xlu1 %v1075_v62  ;;  %1073 = vadd.xlane.f32.xlu0 %v1072_v63 }
 0x994   : >> { %v1077_v0 = vpop.xlane.xlu1 %1076  ;;  %v1074_v1 = vpop.xlane.xlu0 %1073 }
 0x995   : >> { %1836 = vlog2.f32 %v1077_v0 }
 0x996   : >> { %1838 = vlog2.f32 %v1074_v1 }
 0x9a2   : >> { %v1837_v2 = vpop.eup %1836 }
 0x9a3   : >> { %v1839_v3 = vpop.eup %1838  ;;  %v1081_v4 = vmul.f32 0.6931472, %v1837_v2 }
 0x9a4   : >> { %v1079_v5 = vmul.f32 0.6931472, %v1839_v3 }
 0x9a5   : >> { %v1083_v6 = vmul.f32 0.8333333, %v1081_v4 }
 0x9a6   : >> { %v1082_v7 = vmul.f32 0.8333333, %v1079_v5 }
 0x9a7   : >> { %v1085_v8 = vsub.f32 -2.3104906, %v1083_v6 }
 0x9a8   : >> { %v1084_v9 = vsub.f32 -2.3104906, %v1082_v7 }
 0x9a9   : >> { %v1088_v10 = vmul.f32 1.442695, %v1085_v8 }
 0x9aa   : >> { %v1086_v11 = vmul.f32 1.442695, %v1084_v9 }
 0x9ab   : >> { %1840 = vpow2.f32 %v1088_v10 }
 0x9ac   : >> { %1842 = vpow2.f32 %v1086_v11 }
 0x9b8   : >> { %v1841_v12 = vpop.eup %1840 }
 0x9b9   : >> { %v1843_v13 = vpop.eup %1842  ;;  %v1091_v14 = vmul.f32 %v1841_v12, %v2264_v30 }
 0x9ba   : >> { %v1090_v15 = vmul.f32 %v1843_v13, %v2262_v29 }
 0x9bb   : >> { %v1093_v16 = vsel %vm755_vm1, %v1091_v14, 0.0 }
 0x9bc   : >> { %v1092_v17 = vsel %vm755_vm1, %v1090_v15, 0.0 }
 0x9bd   : >> { %v1094_v18 = vadd.f32 %v1093_v16, %v1092_v17 }
 0x9bf   : >> { %v1095_v19 = vrot.slane %v1094_v18, 4 }
 0x9c1   : >> { %v1096_v20 = vadd.f32 %v1095_v19, %v1094_v18 }
 0x9c3   : >> { %v1097_v21 = vrot.slane %v1096_v20, 2 }
 0x9c5   : >> { %v1098_v22 = vadd.f32 %v1097_v21, %v1096_v20 }
 0x9c7   : >> { %v1099_v23 = vrot.slane %v1098_v22, 1 }
 0x9c9   : >> { %v1100_v24 = vadd.f32 %v1099_v23, %v1098_v22 }
 0x9cb   : >> { %1844 = vlog2.f32 %v1100_v24 }
 0x9d8   : >> { %v1845_v25 = vpop.eup %1844 }
 0x9d9   : >> { %v1102_v26 = vmul.f32 0.6931472, %v1845_v25 }
 0x9db   : >> { %v1103_v27 = vmul.f32 0.8333333, %v1102_v26 }
 0x9dd   : >> { %v1104_v28 = vsub.f32 -1.732868, %v1103_v27 }
 0x9df   : >> { %v1105_v34 = vmul.f32 1.442695, %v1104_v28 }
 0x9e1   : >> { %1846 = vpow2.f32 %v1105_v34 }
 0x9ee   : >> { %v1847_v35 = vpop.eup %1846 }
 0x9ef   : >> { %v1108_v36 = vmul.f32 %v1847_v35, %v2264_v30  ;;  %v1107_v37 = vmul.f32 %v1847_v35, %v2262_v29 }
 0x9f1   : >> { %v1112_v38 = vsel %vm755_vm1, %v1108_v36, 0.0  ;;  %v1109_v39 = vsel %vm755_vm1, %v1107_v37, 0.0 }
 0x9f2   : >> { %1113 = vadd.xlane.f32.xlu1 %v1112_v38  ;;  %1110 = vadd.xlane.f32.xlu0 %v1109_v39 }
 0xa7b   : >> { %v1114_v40 = vpop.xlane.xlu1 %1113  ;;  %v1111_v41 = vpop.xlane.xlu0 %1110 }
 0xa7c   : >> { %1848 = vlog2.f32 %v1114_v40 }
 0xa7d   : >> { %1850 = vlog2.f32 %v1111_v41 }
 0xa89   : >> { %v1849_v42 = vpop.eup %1848 }
 0xa8a   : >> { %v1851_v43 = vpop.eup %1850  ;;  %v1118_v44 = vmul.f32 0.6931472, %v1849_v42 }
 0xa8b   : >> { %v1116_v45 = vmul.f32 0.6931472, %v1851_v43 }
 0xa8c   : >> { %v1120_v46 = vmul.f32 0.8333333, %v1118_v44 }
 0xa8d   : >> { %v1119_v47 = vmul.f32 0.8333333, %v1116_v45 }
 0xa8e   : >> { %v1122_v48 = vsub.f32 -2.3104906, %v1120_v46 }
 0xa8f   : >> { %v1121_v49 = vsub.f32 -2.3104906, %v1119_v47 }
 0xa90   : >> { %v1125_v50 = vmul.f32 1.442695, %v1122_v48 }
 0xa91   : >> { %v1123_v51 = vmul.f32 1.442695, %v1121_v49 }
 0xa92   : >> { %1852 = vpow2.f32 %v1125_v50 }
 0xa93   : >> { %1854 = vpow2.f32 %v1123_v51 }
 0xa9f   : >> { %v1853_v52 = vpop.eup %1852 }
 0xaa0   : >> { %v1855_v53 = vpop.eup %1854  ;;  %v1128_v54 = vmul.f32 %v1853_v52, %v2264_v30 }
 0xaa1   : >> { %v1127_v55 = vmul.f32 %v1855_v53, %v2262_v29 }
 0xaa2   : >> { %v1130_v56 = vsel %vm755_vm1, %v1128_v54, 0.0 }
 0xaa3   : >> { %v1129_v57 = vsel %vm755_vm1, %v1127_v55, 0.0 }
 0xaa4   : >> { %v1131_v58 = vadd.f32 %v1130_v56, %v1129_v57 }
 0xaa6   : >> { %v1132_v59 = vrot.slane %v1131_v58, 4 }
 0xaa8   : >> { %v1133_v60 = vadd.f32 %v1132_v59, %v1131_v58 }
 0xaaa   : >> { %v1134_v61 = vrot.slane %v1133_v60, 2 }
 0xaac   : >> { %v1135_v62 = vadd.f32 %v1134_v61, %v1133_v60 }
 0xaae   : >> { %v1136_v63 = vrot.slane %v1135_v62, 1 }
 0xab0   : >> { %v1137_v0 = vadd.f32 %v1136_v63, %v1135_v62 }
 0xab2   : >> { %1856 = vlog2.f32 %v1137_v0 }
 0xabf   : >> { %v1857_v1 = vpop.eup %1856 }
 0xac0   : >> { %v1139_v2 = vmul.f32 0.6931472, %v1857_v1 }
 0xac2   : >> { %v1140_v3 = vmul.f32 0.8333333, %v1139_v2 }
 0xac4   : >> { %v1141_v4 = vsub.f32 -1.732868, %v1140_v3 }
 0xac6   : >> { %v1142_v5 = vmul.f32 1.442695, %v1141_v4 }
 0xac8   : >> { %1858 = vpow2.f32 %v1142_v5 }
 0xad5   : >> { %v1859_v6 = vpop.eup %1858 }
 0xad6   : >> { %v1145_v7 = vmul.f32 %v1859_v6, %v2264_v30  ;;  %v1144_v8 = vmul.f32 %v1859_v6, %v2262_v29 }
 0xad8   : >> { %v1149_v9 = vsel %vm755_vm1, %v1145_v7, 0.0  ;;  %v1146_v10 = vsel %vm755_vm1, %v1144_v8, 0.0 }
 0xad9   : >> { %1150 = vadd.xlane.f32.xlu1 %v1149_v9  ;;  %1147 = vadd.xlane.f32.xlu0 %v1146_v10 }
 0xb62   : >> { %v1151_v11 = vpop.xlane.xlu1 %1150  ;;  %v1148_v12 = vpop.xlane.xlu0 %1147 }
 0xb63   : >> { %1860 = vlog2.f32 %v1151_v11 }
 0xb64   : >> { %1862 = vlog2.f32 %v1148_v12 }
 0xb70   : >> { %v1861_v13 = vpop.eup %1860 }
 0xb71   : >> { %v1863_v14 = vpop.eup %1862  ;;  %v1155_v15 = vmul.f32 0.6931472, %v1861_v13 }
 0xb72   : >> { %v1153_v16 = vmul.f32 0.6931472, %v1863_v14 }
 0xb73   : >> { %v1157_v17 = vmul.f32 0.8333333, %v1155_v15 }
 0xb74   : >> { %v1156_v18 = vmul.f32 0.8333333, %v1153_v16 }
 0xb75   : >> { %v1159_v19 = vsub.f32 -2.3104906, %v1157_v17 }
 0xb76   : >> { %v1158_v20 = vsub.f32 -2.3104906, %v1156_v18 }
 0xb77   : >> { %v1162_v21 = vmul.f32 1.442695, %v1159_v19 }
 0xb78   : >> { %v1160_v22 = vmul.f32 1.442695, %v1158_v20 }
 0xb79   : >> { %1864 = vpow2.f32 %v1162_v21 }
 0xb7a   : >> { %1866 = vpow2.f32 %v1160_v22 }
 0xb86   : >> { %v1865_v23 = vpop.eup %1864 }
 0xb87   : >> { %v1867_v24 = vpop.eup %1866  ;;  %v1165_v25 = vmul.f32 %v1865_v23, %v2264_v30 }
 0xb88   : >> { %v1164_v26 = vmul.f32 %v1867_v24, %v2262_v29 }
 0xb89   : >> { %v1167_v27 = vsel %vm755_vm1, %v1165_v25, 0.0 }
 0xb8a   : >> { %v1166_v28 = vsel %vm755_vm1, %v1164_v26, 0.0 }
 0xb8b   : >> { %v1168_v34 = vadd.f32 %v1167_v27, %v1166_v28 }
 0xb8d   : >> { %v1169_v35 = vrot.slane %v1168_v34, 4 }
 0xb8f   : >> { %v1170_v36 = vadd.f32 %v1169_v35, %v1168_v34 }
 0xb91   : >> { %v1171_v37 = vrot.slane %v1170_v36, 2 }
 0xb93   : >> { %v1172_v38 = vadd.f32 %v1171_v37, %v1170_v36 }
 0xb95   : >> { %v1173_v39 = vrot.slane %v1172_v38, 1 }
 0xb97   : >> { %v1174_v40 = vadd.f32 %v1173_v39, %v1172_v38 }
 0xb99   : >> { %1868 = vlog2.f32 %v1174_v40 }
 0xba6   : >> { %v1869_v41 = vpop.eup %1868 }
 0xba7   : >> { %v1176_v42 = vmul.f32 0.6931472, %v1869_v41 }
 0xba9   : >> { %v1177_v43 = vmul.f32 0.8333333, %v1176_v42 }
 0xbab   : >> { %v1178_v44 = vsub.f32 -1.732868, %v1177_v43 }
 0xbad   : >> { %v1179_v45 = vmul.f32 1.442695, %v1178_v44 }
 0xbaf   : >> { %1870 = vpow2.f32 %v1179_v45 }
 0xbbc   : >> { %v1871_v46 = vpop.eup %1870 }
 0xbbd   : >> { %v1182_v47 = vmul.f32 %v1871_v46, %v2264_v30  ;;  %v1181_v48 = vmul.f32 %v1871_v46, %v2262_v29 }
 0xbbf   : >> { %v1186_v49 = vsel %vm755_vm1, %v1182_v47, 0.0  ;;  %v1183_v50 = vsel %vm755_vm1, %v1181_v48, 0.0 }
 0xbc0   : >> { %1187 = vadd.xlane.f32.xlu1 %v1186_v49  ;;  %1184 = vadd.xlane.f32.xlu0 %v1183_v50 }
 0xc49   : >> { %v1188_v51 = vpop.xlane.xlu1 %1187  ;;  %v1185_v52 = vpop.xlane.xlu0 %1184 }
 0xc4a   : >> { %1872 = vlog2.f32 %v1188_v51 }
 0xc4b   : >> { %1874 = vlog2.f32 %v1185_v52 }
 0xc57   : >> { %v1873_v53 = vpop.eup %1872 }
 0xc58   : >> { %v1875_v54 = vpop.eup %1874  ;;  %v1192_v55 = vmul.f32 0.6931472, %v1873_v53 }
 0xc59   : >> { %v1190_v56 = vmul.f32 0.6931472, %v1875_v54 }
 0xc5a   : >> { %v1194_v57 = vmul.f32 0.8333333, %v1192_v55 }
 0xc5b   : >> { %v1193_v58 = vmul.f32 0.8333333, %v1190_v56 }
 0xc5c   : >> { %v1196_v59 = vsub.f32 -2.3104906, %v1194_v57 }
 0xc5d   : >> { %v1195_v60 = vsub.f32 -2.3104906, %v1193_v58 }
 0xc5e   : >> { %v1199_v61 = vmul.f32 1.442695, %v1196_v59 }
 0xc5f   : >> { %v1197_v62 = vmul.f32 1.442695, %v1195_v60 }
 0xc60   : >> { %1876 = vpow2.f32 %v1199_v61 }
 0xc61   : >> { %1878 = vpow2.f32 %v1197_v62 }
 0xc6d   : >> { %v1877_v63 = vpop.eup %1876 }
 0xc6e   : >> { %v1879_v0 = vpop.eup %1878  ;;  %v1202_v1 = vmul.f32 %v1877_v63, %v2264_v30 }
 0xc6f   : >> { %v1201_v2 = vmul.f32 %v1879_v0, %v2262_v29 }
 0xc70   : >> { %v1204_v3 = vsel %vm755_vm1, %v1202_v1, 0.0 }
 0xc71   : >> { %v1203_v4 = vsel %vm755_vm1, %v1201_v2, 0.0 }
 0xc72   : >> { %v1205_v5 = vadd.f32 %v1204_v3, %v1203_v4 }
 0xc74   : >> { %v1206_v6 = vrot.slane %v1205_v5, 4 }
 0xc76   : >> { %v1207_v7 = vadd.f32 %v1206_v6, %v1205_v5 }
 0xc78   : >> { %v1208_v8 = vrot.slane %v1207_v7, 2 }
 0xc7a   : >> { %v1209_v9 = vadd.f32 %v1208_v8, %v1207_v7 }
 0xc7c   : >> { %v1210_v10 = vrot.slane %v1209_v9, 1 }
 0xc7e   : >> { %v1211_v11 = vadd.f32 %v1210_v10, %v1209_v9 }
 0xc80   : >> { %1880 = vlog2.f32 %v1211_v11 }
 0xc8d   : >> { %v1881_v12 = vpop.eup %1880 }
 0xc8e   : >> { %v1213_v13 = vmul.f32 0.6931472, %v1881_v12 }
 0xc90   : >> { %v1214_v14 = vmul.f32 0.8333333, %v1213_v13 }
 0xc92   : >> { %v1215_v15 = vsub.f32 -1.732868, %v1214_v14 }
 0xc94   : >> { %v1216_v16 = vmul.f32 1.442695, %v1215_v15 }
 0xc96   : >> { %1882 = vpow2.f32 %v1216_v16 }
 0xca3   : >> { %v1883_v17 = vpop.eup %1882 }
 0xca4   : >> { %v1219_v18 = vmul.f32 %v1883_v17, %v2264_v30  ;;  %v1218_v19 = vmul.f32 %v1883_v17, %v2262_v29 }
 0xca6   : >> { %v1223_v20 = vsel %vm755_vm1, %v1219_v18, 0.0  ;;  %v1220_v21 = vsel %vm755_vm1, %v1218_v19, 0.0 }
 0xca7   : >> { %1224 = vadd.xlane.f32.xlu1 %v1223_v20  ;;  %1221 = vadd.xlane.f32.xlu0 %v1220_v21 }
 0xd30   : >> { %v1225_v22 = vpop.xlane.xlu1 %1224  ;;  %v1222_v23 = vpop.xlane.xlu0 %1221 }
 0xd31   : >> { %1884 = vlog2.f32 %v1225_v22 }
 0xd32   : >> { %1886 = vlog2.f32 %v1222_v23 }
 0xd3e   : >> { %v1885_v24 = vpop.eup %1884 }
 0xd3f   : >> { %v1887_v25 = vpop.eup %1886  ;;  %v1229_v26 = vmul.f32 0.6931472, %v1885_v24 }
 0xd40   : >> { %v1227_v27 = vmul.f32 0.6931472, %v1887_v25 }
 0xd41   : >> { %v1231_v28 = vmul.f32 0.8333333, %v1229_v26 }
 0xd42   : >> { %v1230_v34 = vmul.f32 0.8333333, %v1227_v27 }
 0xd43   : >> { %v1233_v35 = vsub.f32 -2.3104906, %v1231_v28 }
 0xd44   : >> { %v1232_v36 = vsub.f32 -2.3104906, %v1230_v34 }
 0xd45   : >> { %v1236_v37 = vmul.f32 1.442695, %v1233_v35 }
 0xd46   : >> { %v1234_v38 = vmul.f32 1.442695, %v1232_v36 }
 0xd47   : >> { %1888 = vpow2.f32 %v1236_v37 }
 0xd48   : >> { %1890 = vpow2.f32 %v1234_v38 }
 0xd54   : >> { %v1889_v39 = vpop.eup %1888 }
 0xd55   : >> { %v1891_v40 = vpop.eup %1890  ;;  %v1239_v41 = vmul.f32 %v1889_v39, %v2264_v30 }
 0xd56   : >> { %v1238_v42 = vmul.f32 %v1891_v40, %v2262_v29 }
 0xd57   : >> { %v1241_v43 = vsel %vm755_vm1, %v1239_v41, 0.0 }
 0xd58   : >> { %v1240_v44 = vsel %vm755_vm1, %v1238_v42, 0.0 }
 0xd59   : >> { %v1242_v45 = vadd.f32 %v1241_v43, %v1240_v44 }
 0xd5b   : >> { %v1243_v46 = vrot.slane %v1242_v45, 4 }
 0xd5d   : >> { %v1244_v47 = vadd.f32 %v1243_v46, %v1242_v45 }
 0xd5f   : >> { %v1245_v48 = vrot.slane %v1244_v47, 2 }
 0xd61   : >> { %v1246_v49 = vadd.f32 %v1245_v48, %v1244_v47 }
 0xd63   : >> { %v1247_v50 = vrot.slane %v1246_v49, 1 }
 0xd65   : >> { %v1248_v51 = vadd.f32 %v1247_v50, %v1246_v49 }
 0xd67   : >> { %1892 = vlog2.f32 %v1248_v51 }
 0xd74   : >> { %v1893_v52 = vpop.eup %1892 }
 0xd75   : >> { %v1250_v53 = vmul.f32 0.6931472, %v1893_v52 }
 0xd77   : >> { %v1251_v54 = vmul.f32 0.8333333, %v1250_v53 }
 0xd79   : >> { %v1252_v55 = vsub.f32 -1.732868, %v1251_v54 }
 0xd7b   : >> { %v1253_v56 = vmul.f32 1.442695, %v1252_v55 }
 0xd7d   : >> { %1894 = vpow2.f32 %v1253_v56 }
 0xd8a   : >> { %v1895_v57 = vpop.eup %1894 }
 0xd8b   : >> { %v1256_v58 = vmul.f32 %v1895_v57, %v2264_v30  ;;  %v1255_v59 = vmul.f32 %v1895_v57, %v2262_v29 }
 0xd8d   : >> { %v1260_v60 = vsel %vm755_vm1, %v1256_v58, 0.0  ;;  %v1257_v61 = vsel %vm755_vm1, %v1255_v59, 0.0 }
 0xd8e   : >> { %1261 = vadd.xlane.f32.xlu1 %v1260_v60  ;;  %1258 = vadd.xlane.f32.xlu0 %v1257_v61 }
 0xe17   : >> { %v1262_v62 = vpop.xlane.xlu1 %1261  ;;  %v1259_v63 = vpop.xlane.xlu0 %1258 }
 0xe18   : >> { %1896 = vlog2.f32 %v1262_v62 }
 0xe19   : >> { %1898 = vlog2.f32 %v1259_v63 }
 0xe25   : >> { %v1897_v0 = vpop.eup %1896 }
 0xe26   : >> { %v1899_v1 = vpop.eup %1898  ;;  %v1266_v2 = vmul.f32 0.6931472, %v1897_v0 }
 0xe27   : >> { %v1264_v3 = vmul.f32 0.6931472, %v1899_v1 }
 0xe28   : >> { %v1268_v4 = vmul.f32 0.8333333, %v1266_v2 }
 0xe29   : >> { %v1267_v5 = vmul.f32 0.8333333, %v1264_v3 }
 0xe2a   : >> { %v1270_v6 = vsub.f32 -2.3104906, %v1268_v4 }
 0xe2b   : >> { %v1269_v7 = vsub.f32 -2.3104906, %v1267_v5 }
 0xe2c   : >> { %v1273_v8 = vmul.f32 1.442695, %v1270_v6 }
 0xe2d   : >> { %v1271_v9 = vmul.f32 1.442695, %v1269_v7 }
 0xe2e   : >> { %1900 = vpow2.f32 %v1273_v8 }
 0xe2f   : >> { %1902 = vpow2.f32 %v1271_v9 }
 0xe3b   : >> { %v1901_v10 = vpop.eup %1900 }
 0xe3c   : >> { %v1903_v11 = vpop.eup %1902  ;;  %v1276_v12 = vmul.f32 %v1901_v10, %v2264_v30 }
 0xe3d   : >> { %v1275_v13 = vmul.f32 %v1903_v11, %v2262_v29 }
 0xe3e   : >> { %v1278_v14 = vsel %vm755_vm1, %v1276_v12, 0.0 }
 0xe3f   : >> { %v1277_v15 = vsel %vm755_vm1, %v1275_v13, 0.0 }
 0xe40   : >> { %v1279_v16 = vadd.f32 %v1278_v14, %v1277_v15 }
 0xe42   : >> { %v1280_v17 = vrot.slane %v1279_v16, 4 }
 0xe44   : >> { %v1281_v18 = vadd.f32 %v1280_v17, %v1279_v16 }
 0xe46   : >> { %v1282_v19 = vrot.slane %v1281_v18, 2 }
 0xe48   : >> { %v1283_v20 = vadd.f32 %v1282_v19, %v1281_v18 }
 0xe4a   : >> { %v1284_v21 = vrot.slane %v1283_v20, 1 }
 0xe4c   : >> { %v1285_v22 = vadd.f32 %v1284_v21, %v1283_v20 }
 0xe4e   : >> { %1904 = vlog2.f32 %v1285_v22 }
 0xe5b   : >> { %v1905_v23 = vpop.eup %1904 }
 0xe5c   : >> { %v1287_v24 = vmul.f32 0.6931472, %v1905_v23 }
 0xe5e   : >> { %v1288_v25 = vmul.f32 0.8333333, %v1287_v24 }
 0xe60   : >> { %v1289_v26 = vsub.f32 -1.732868, %v1288_v25 }
 0xe62   : >> { %v1290_v27 = vmul.f32 1.442695, %v1289_v26 }
 0xe64   : >> { %1906 = vpow2.f32 %v1290_v27 }
 0xe71   : >> { %v1907_v28 = vpop.eup %1906 }
 0xe72   : >> { %v1293_v34 = vmul.f32 %v1907_v28, %v2264_v30  ;;  %v1292_v35 = vmul.f32 %v1907_v28, %v2262_v29 }
 0xe74   : >> { %v1297_v36 = vsel %vm755_vm1, %v1293_v34, 0.0  ;;  %v1294_v37 = vsel %vm755_vm1, %v1292_v35, 0.0 }
 0xe75   : >> { %1298 = vadd.xlane.f32.xlu1 %v1297_v36  ;;  %1295 = vadd.xlane.f32.xlu0 %v1294_v37 }
 0xefe   : >> { %v1299_v38 = vpop.xlane.xlu1 %1298  ;;  %v1296_v39 = vpop.xlane.xlu0 %1295 }
 0xeff   : >> { %1908 = vlog2.f32 %v1299_v38 }
 0xf00   : >> { %1910 = vlog2.f32 %v1296_v39 }
 0xf0c   : >> { %v1909_v40 = vpop.eup %1908 }
 0xf0d   : >> { %v1911_v41 = vpop.eup %1910  ;;  %v1303_v42 = vmul.f32 0.6931472, %v1909_v40 }
 0xf0e   : >> { %v1301_v43 = vmul.f32 0.6931472, %v1911_v41 }
 0xf0f   : >> { %v1305_v44 = vmul.f32 0.8333333, %v1303_v42 }
 0xf10   : >> { %v1304_v45 = vmul.f32 0.8333333, %v1301_v43 }
 0xf11   : >> { %v1307_v46 = vsub.f32 -2.3104906, %v1305_v44 }
 0xf12   : >> { %v1306_v47 = vsub.f32 -2.3104906, %v1304_v45 }
 0xf13   : >> { %v1310_v48 = vmul.f32 1.442695, %v1307_v46 }
 0xf14   : >> { %v1308_v49 = vmul.f32 1.442695, %v1306_v47 }
 0xf15   : >> { %1912 = vpow2.f32 %v1310_v48 }
 0xf16   : >> { %1914 = vpow2.f32 %v1308_v49 }
 0xf22   : >> { %v1913_v50 = vpop.eup %1912 }
 0xf23   : >> { %v1915_v51 = vpop.eup %1914  ;;  %v1313_v52 = vmul.f32 %v1913_v50, %v2264_v30 }
 0xf24   : >> { %v1312_v53 = vmul.f32 %v1915_v51, %v2262_v29 }
 0xf25   : >> { %v1315_v54 = vsel %vm755_vm1, %v1313_v52, 0.0 }
 0xf26   : >> { %v1314_v55 = vsel %vm755_vm1, %v1312_v53, 0.0 }
 0xf27   : >> { %v1316_v56 = vadd.f32 %v1315_v54, %v1314_v55 }
 0xf29   : >> { %v1317_v57 = vrot.slane %v1316_v56, 4 }
 0xf2b   : >> { %v1318_v58 = vadd.f32 %v1317_v57, %v1316_v56 }
 0xf2d   : >> { %v1319_v59 = vrot.slane %v1318_v58, 2 }
 0xf2f   : >> { %v1320_v60 = vadd.f32 %v1319_v59, %v1318_v58 }
 0xf31   : >> { %v1321_v61 = vrot.slane %v1320_v60, 1 }
 0xf33   : >> { %v1322_v62 = vadd.f32 %v1321_v61, %v1320_v60 }
 0xf35   : >> { %1916 = vlog2.f32 %v1322_v62 }
 0xf42   : >> { %v1917_v63 = vpop.eup %1916 }
 0xf43   : >> { %v1324_v0 = vmul.f32 0.6931472, %v1917_v63 }
 0xf45   : >> { %v1325_v1 = vmul.f32 0.8333333, %v1324_v0 }
 0xf47   : >> { %v1326_v2 = vsub.f32 -1.732868, %v1325_v1 }
 0xf49   : >> { %v1327_v3 = vmul.f32 1.442695, %v1326_v2 }
 0xf4b   : >> { %1918 = vpow2.f32 %v1327_v3 }
 0xf58   : >> { %v1919_v4 = vpop.eup %1918 }
 0xf59   : >> { %v1330_v5 = vmul.f32 %v1919_v4, %v2264_v30  ;;  %v1329_v6 = vmul.f32 %v1919_v4, %v2262_v29 }
 0xf5b   : >> { %v1334_v7 = vsel %vm755_vm1, %v1330_v5, 0.0  ;;  %v1331_v8 = vsel %vm755_vm1, %v1329_v6, 0.0 }
 0xf5c   : >> { %1335 = vadd.xlane.f32.xlu1 %v1334_v7  ;;  %1332 = vadd.xlane.f32.xlu0 %v1331_v8 }
 0xfe5   : >> { %v1336_v9 = vpop.xlane.xlu1 %1335  ;;  %v1333_v10 = vpop.xlane.xlu0 %1332 }
 0xfe6   : >> { %1920 = vlog2.f32 %v1336_v9 }
 0xfe7   : >> { %1922 = vlog2.f32 %v1333_v10 }
 0xff3   : >> { %v1921_v11 = vpop.eup %1920 }
 0xff4   : >> { %v1923_v12 = vpop.eup %1922  ;;  %v1340_v13 = vmul.f32 0.6931472, %v1921_v11 }
 0xff5   : >> { %v1338_v14 = vmul.f32 0.6931472, %v1923_v12 }
 0xff6   : >> { %v1342_v15 = vmul.f32 0.8333333, %v1340_v13 }
 0xff7   : >> { %v1341_v16 = vmul.f32 0.8333333, %v1338_v14 }
 0xff8   : >> { %v1344_v17 = vsub.f32 -2.3104906, %v1342_v15 }
 0xff9   : >> { %v1343_v18 = vsub.f32 -2.3104906, %v1341_v16 }
 0xffa   : >> { %v1347_v19 = vmul.f32 1.442695, %v1344_v17 }
 0xffb   : >> { %v1345_v20 = vmul.f32 1.442695, %v1343_v18 }
 0xffc   : >> { %1924 = vpow2.f32 %v1347_v19 }
 0xffd   : >> { %1926 = vpow2.f32 %v1345_v20 }
0x1009   : >> { %v1925_v21 = vpop.eup %1924 }
0x100a   : >> { %v1927_v22 = vpop.eup %1926  ;;  %v1350_v23 = vmul.f32 %v1925_v21, %v2264_v30 }
0x100b   : >> { %v1349_v24 = vmul.f32 %v1927_v22, %v2262_v29 }
0x100c   : >> { %v1352_v25 = vsel %vm755_vm1, %v1350_v23, 0.0 }
0x100d   : >> { %v1351_v26 = vsel %vm755_vm1, %v1349_v24, 0.0 }
0x100e   : >> { %v1353_v27 = vadd.f32 %v1352_v25, %v1351_v26 }
0x1010   : >> { %v1354_v28 = vrot.slane %v1353_v27, 4 }
0x1012   : >> { %v1355_v34 = vadd.f32 %v1354_v28, %v1353_v27 }
0x1014   : >> { %v1356_v35 = vrot.slane %v1355_v34, 2 }
0x1016   : >> { %v1357_v36 = vadd.f32 %v1356_v35, %v1355_v34 }
0x1018   : >> { %v1358_v37 = vrot.slane %v1357_v36, 1 }
0x101a   : >> { %v1359_v38 = vadd.f32 %v1358_v37, %v1357_v36 }
0x101c   : >> { %1928 = vlog2.f32 %v1359_v38 }
0x1029   : >> { %v1929_v39 = vpop.eup %1928 }
0x102a   : >> { %v1361_v40 = vmul.f32 0.6931472, %v1929_v39 }
0x102c   : >> { %v1362_v41 = vmul.f32 0.8333333, %v1361_v40 }
0x102e   : >> { %v1363_v42 = vsub.f32 -1.732868, %v1362_v41 }
0x1030   : >> { %v1364_v43 = vmul.f32 1.442695, %v1363_v42 }
0x1032   : >> { %1930 = vpow2.f32 %v1364_v43 }
0x103f   : >> { %v2422_v44 = vpop.eup %1930 }
0x1040   : >> { %v1367_v45 = vmul.f32 %v2422_v44, %v2264_v30  ;;  %v1366_v46 = vmul.f32 %v2422_v44, %v2262_v29  ;;  %v1405_v47 = vsub.f32 %v2422_v44, %v2074_v33  ;;  %v1386_v51 = vand.u32 2147483647, %v2422_v44 }
0x1042   : >> { %v1371_v48 = vsel %vm755_vm1, %v1367_v45, 0.0  ;;  %v1368_v49 = vsel %vm755_vm1, %v1366_v46, 0.0  ;;  %v1406_v50 = vand.u32 2147483647, %v1405_v47  ;;  %v1387_v53 = vsel %vm755_vm1, %v1386_v51, -inf }
0x1043   : >> { %1372 = vadd.xlane.f32.xlu1 %v1371_v48  ;;  %1369 = vadd.xlane.f32.xlu0 %v1368_v49 }
0x1044   : >> { %v1407_v52 = vsel %vm755_vm1, %v1406_v50, -inf }
0x1047   : >> { %1408 = vmax.xlane.f32.xlu1 %v1407_v52  ;;  %1388 = vmax.xlane.f32.xlu0 %v1387_v53 }
0x10cc   : >> { %v1373_v54 = vpop.xlane.xlu1 %1372  ;;  %v1370_v55 = vpop.xlane.xlu0 %1369 }
0x10cd   : >> { %1932 = vlog2.f32 %v1373_v54 }
0x10ce   : >> { %1934 = vlog2.f32 %v1370_v55 }
0x10d0   : >> { %v1389_v56 = vpop.xlane.xlu0 %1388  ;;  %v1409_v20 = vpop.xlane.xlu1 %1408 }
0x10d1   : >> { %1635 = vpush %v1389_v56 }
0x10da   : >> { %v1933_v57 = vpop.eup %1932 }
0x10db   : >> { %v1935_v58 = vpop.eup %1934  ;;  %v1377_v59 = vmul.f32 0.6931472, %v1933_v57 }
0x10dc   : >> { %v1375_v60 = vmul.f32 0.6931472, %v1935_v58 }
0x10dd   : >> { %v1379_v61 = vmul.f32 0.8333333, %v1377_v59 }
0x10de   : >> { %v1378_v62 = vmul.f32 0.8333333, %v1375_v60 }
0x10df   : >> { %v1381_v63 = vsub.f32 -2.3104906, %v1379_v61 }
0x10e0   : >> { %v1380_v0 = vsub.f32 -2.3104906, %v1378_v62 }
0x10e1   : >> { %v1384_v1 = vmul.f32 1.442695, %v1381_v63 }
0x10e2   : >> { %v1382_v2 = vmul.f32 1.442695, %v1380_v0 }
0x10e3   : >> { %1936 = vpow2.f32 %v1384_v1 }
0x10e4   : >> { %1938 = vpow2.f32 %v1382_v2 }
0x10f0   : >> { %v1937_v3 = vpop.eup %1936 }
0x10f1   : >> { %v1939_v4 = vpop.eup %1938  ;;  %v1392_v5 = vand.u32 2147483647, %v1937_v3  ;;  %v1418_v8 = vsub.f32 %v1937_v3, %v2066_v31 }
0x10f2   : >> { %v1391_v6 = vand.u32 2147483647, %v1939_v4  ;;  %v1417_v7 = vsub.f32 %v1939_v4, %v2070_v32 }
0x10f3   : >> { %v1420_v12 = vand.u32 2147483647, %v1418_v8 }
0x10f4   : >> { %v1393_v9 = vmax.f32.f32 %v1391_v6, %v1392_v5  ;;  %v1419_v11 = vand.u32 2147483647, %v1417_v7 }
0x10f6   : >> { %v1394_v10 = vrot.slane %v1393_v9, 4  ;;  %v1421_v15 = vmax.f32.f32 %v1419_v11, %v1420_v12 }
0x10f8   : >> { %v1395_v13 = vmax.f32 %v1393_v9, %v1394_v10  ;;  %v1422_v18 = vrot.slane %v1421_v15, 4 }
0x10fa   : >> { %v1396_v14 = vrot.slane %v1395_v13, 2  ;;  %v1423_v21 = vmax.f32 %v1421_v15, %v1422_v18 }
0x10fc   : >> { %v1397_v16 = vmax.f32 %v1395_v13, %v1396_v14  ;;  %v1424_v23 = vrot.slane %v1423_v21, 2 }
0x10fe   : >> { %v1398_v17 = vrot.slane %v1397_v16, 1  ;;  %v1425_v24 = vmax.f32 %v1423_v21, %v1424_v23 }
0x1100   : >> { %v1399_v19 = vmax.f32 %v1397_v16, %v1398_v17  ;;  %v1426_v25 = vrot.slane %v1425_v24, 1 }
0x1102   : >> { %1637 = vpush %v1399_v19  ;;  %s2438_s3 = spop %1635  ;;  %v1427_v27 = vmax.f32 %v1425_v24, %v1426_v25 }
0x1103   : >> { %1639 = vpush %v1409_v20  ;;  %s1411_s4 = smax.f32 %s2082_s30, %s2438_s3  ;;  %p1401_p12 = scmp.lt.f32.partialorder %s2438_s3, 3e+38 }
0x1104   : >> { %s1412_s6 = smax.f32 %s2092_s5, %s1411_s4 }
0x1105   : >> { %v1413_v22 = vstv %s1412_s6 }
0x1106   : >> { %1940 = vrcp.f32 %v1413_v22 }
0x1113   : >> { %v1941_v26 = vpop.eup %1940 }
0x1114   : >> { %1641 = vpush %v1941_v26 }
0x1115   : >> { %1643 = vpush %v1427_v27 }
0x1133   : >> { %s2443_s7 = spop %1637 }
0x1134   : >> { %p1402_p3 = scmp.lt.f32.partialorder %s2443_s7, 3e+38  ;;  %s1429_s8 = smax.f32 %s2078_s13, %s2443_s7 }
0x1135   : >> { %s1430_s9 = smax.f32 %s2092_s5, %s1429_s8  ;;  %s1640_s21 = spop %1639 }
0x1136   : >> { %p2448_p4 = pnand %p1402_p3, %p1401_p12  ;;  %v1431_v28 = vstv %s1430_s9 }
0x1137   : >> { %1942 = vrcp.f32 %v1431_v28 }
0x1138   : >> { %s1580_s20 = scalar_select %p2448_p4, 0, 1 }
0x1139   : >> { %s2525_s30 = smov (!%p2448_p4, %s2082_s30), %s2438_s3  ;;  %s2527_s13 = smov (!%p2448_p4, %s2078_s13), %s2443_s7 }
0x113a   : >> { %v1439_v34 = vstv %s1580_s20 }
0x113b   : >> { %vm1440_vm3 = vcmp.eq.s32.totalorder %v1439_v34, 1 }
0x113c   : >> { %v1441_v35 = vsel %vm1440_vm3, %v2422_v44, %v2074_v33   ;;  %v1442_v36 = vsel %vm1440_vm3, %v1939_v4, %v2070_v32   ;;  %v1443_v37 = vsel %vm1440_vm3, %v1937_v3, %v2066_v31  }
0x113d   : >> { %v2514_v31 = vmov %v1443_v37  ;;  %v2515_v32 = vmov %v1442_v36  ;;  %v2516_v33 = vmov %v1441_v35 }
0x1144   : >> { %v1943_v38 = vpop.eup %1942 }
0x1145   : >> { %1645 = vpush %v1943_v38  ;;  %s1642_s22 = spop %1641 }
0x1146   : >> { %s1644_s23 = spop %1643  ;;  %s1416_s29 = smul.f32 %s1642_s22, %s1640_s21 }
0x1176   : >> { %s1646_s26 = spop %1645 }
0x1177   : >> { %s1434_s12 = smul.f32 %s1646_s26, %s1644_s23 }
0x1179   : >> { %s1435_s27 = sadd.f32 %s1434_s12, %s1416_s29 }
0x117b   : >> { %s1436_s19 = smul.f32 0.5, %s1435_s27 }
0x117d   : >> { %s2529_s19 = smov (%p2448_p4, %s1436_s19), 0.0 }
0x117e   : >> { %p789_p11 = scmp.gt.f32.partialorder %s2529_s19, 1e-06 }
0x1180   : >> { %p790_p13 = pnand %p789_p11, %p788_p6 }
0x1181   : > { %v1447_v33 = vmul.f32 (%p790_p13), %v2262_v29, %v1441_v35  ;;  %v1448_v39 = vmul.f32 (%p790_p13), %v2264_v30, %v1441_v35 }
0x1182   : > { %793 = sbr.rel (!%p790_p13) target bundleno = 636 (0x27c), region = 88 }
0x1183   : > { %v1449_v40 = vmul.f32 (%p790_p13), %v1447_v33, %v1442_v36  ;;  %v1450_v41 = vmul.f32 (%p790_p13), %v1448_v39, %v1443_v37 }
0x1185   : > { %1451 = vst.msk [vmem:[%s2252_s25] sm:$0xff] (%p790_p13), %vm755_vm1, %v1449_v40  ;;  %1452 = vst.msk [vmem:[%s2252_s25 + $0x8] sm:$0xff] (%p790_p13), %vm755_vm1, %v1450_v41 }
0x1187 PF: > { %p15_p1 = scmp.ge.s32.totalorder %s2130_s14, 4   ;;  %s2518_s9 = smov %s2054_s10 }
0x1188   : > { %s2519_s10 = smov %s2058_s11  ;;  %s2520_s11 = smov %s2140_s17 }
0x1189   : > { %s2521_s12 = smov %s2130_s14  ;;  %17 = sbr.rel (!%p15_p1) target bundleno = 5 (0x5), region = 99 }
0x118e   :  { %1474 = vsyncpa [#allocation3], 1 }
0x118f   :  { %1476 = vsyncpa [#allocation3 + $0x1], 1 }
0x1190   :  { %1477 = vsyncpa [#allocation5], 1 }
0x1191   :  { %1479 = vsyncpa [#allocation5 + $0x1], 1 }

</bundles_post_ra>
